<compile_context>
chip_gen: v5e
topology: v5e:2x2
jax: 0.10.0
libtpu: 0.0.40
codegen_flags: <defaults>
</compile_context>

<pallas_src>
import functools

import jax
import jax.numpy as jnp
from jax.experimental import pallas as pl
from jax.experimental.pallas import tpu as pltpu

LANE = 128          # feature dims padded to multiples of the 128-lane vreg width
BATCH_TILE = 512    # max rows per grid step (512 measured close to HBM roofline)


def _round_up(x, m):
    return ((x + m - 1) // m) * m


def _softplus(x):
    # numerically stable softplus, stays on VPU/EUP
    return jnp.maximum(x, 0.0) + jnp.log1p(jnp.exp(-jnp.abs(x)))


def conditional_prior_kernel(
    s_ref, eps_ref,
    w1_ref, b1_ref, w2_ref, b2_ref,        # prior MLP (weights bf16, biases f32)
    whead_ref, bhead_ref,                  # fused Gaussian head: [Hp, 2*Lp] / [1, 2*Lp]
    wr1_ref, br1_ref, wr2_ref, br2_ref,    # reconstructor MLP
    wr3_ref, br3_ref,
    out_ref,                               # compact packed (TB, W): [rec | mean | var | z | 0pad]
    *, L, R, Lp,
):
    f32 = jnp.float32
    bf16 = jnp.bfloat16
    s = s_ref[...]

    # ---- prior network: Linear -> ReLU -> Linear -> ReLU (bf16 matmul, f32 accumulate) ----
    h = jnp.dot(s.astype(bf16), w1_ref[...], preferred_element_type=f32) + b1_ref[...]
    h = jnp.maximum(h, 0.0)
    h = jnp.dot(h.astype(bf16), w2_ref[...], preferred_element_type=f32) + b2_ref[...]
    h = jnp.maximum(h, 0.0)

    # ---- fused Gaussian head: one [Hp, 2*Lp] matmul, slice mean / raw-var out ----
    head = jnp.dot(h.astype(bf16), whead_ref[...], preferred_element_type=f32) + bhead_ref[...]
    mean = head[:, :Lp]
    var = _softplus(head[:, Lp:])
    z = mean + eps_ref[...] * jnp.sqrt(var + 1e-10)

    # ---- reconstructor: Linear -> ReLU -> Linear -> ReLU -> Linear -> Sigmoid ----
    r = jnp.dot(z.astype(bf16), wr1_ref[...], preferred_element_type=f32) + br1_ref[...]
    r = jnp.maximum(r, 0.0)
    r = jnp.dot(r.astype(bf16), wr2_ref[...], preferred_element_type=f32) + br2_ref[...]
    r = jnp.maximum(r, 0.0)
    logits = jnp.dot(r.astype(bf16), wr3_ref[...], preferred_element_type=f32) + br3_ref[...]
    # sigmoid: exp on EUP, approx reciprocal stays on EUP; clip keeps rec in [0, 1]
    rec = jnp.clip(pl.reciprocal(1.0 + jnp.exp(-logits), approx=True), 0.0, 1.0)

    # ---- compact lane-packed output: [rec(R) | mean(L) | var(L) | z(L) | zero tail] ----
    rows = s.shape[0]
    used = R + 3 * L
    parts = [rec[:, :R], mean[:, :L], var[:, :L], z[:, :L]]
    tail = out_ref.shape[1] - used
    if tail > 0:                                      # static (trace-time) decision
        parts.append(jnp.zeros((rows, tail), f32))
    out_ref[...] = jnp.concatenate(parts, axis=1)     # single lane-dense full-width store


def pack_params(params):
    """Fuse the Gaussian head, zero-pad feature dims to 128 lanes, store weights in bf16."""
    L, H = params["w1"].shape
    R = params["wr3"].shape[1]
    Lp, Hp = _round_up(L, LANE), _round_up(H, LANE)
    W = _round_up(R + 3 * L, LANE)   # compact packed-output width

    def pad(a, rows, cols, dtype):
        out = jnp.zeros((rows, cols), dtype)
        return out.at[: a.shape[0], : a.shape[1]].set(a.astype(dtype))

    wpad = lambda a, r, c: pad(a, r, c, jnp.bfloat16)   # matmul weights in bf16
    bpad = lambda a, c: pad(a, 1, c, jnp.float32)       # biases stay f32

    packed = dict(
        w1=wpad(params["w1"], Lp, Hp), b1=bpad(params["b1"], Hp),
        w2=wpad(params["w2"], Hp, Hp), b2=bpad(params["b2"], Hp),
        whead=jnp.concatenate(
            [wpad(params["wmu"], Hp, Lp), wpad(params["wvar"], Hp, Lp)], axis=1),
        bhead=jnp.concatenate(
            [bpad(params["bmu"], Lp), bpad(params["bvar"], Lp)], axis=1),
        wr1=wpad(params["wr1"], Lp, Hp), br1=bpad(params["br1"], Hp),
        wr2=wpad(params["wr2"], Hp, Hp), br2=bpad(params["br2"], Hp),
        wr3=wpad(params["wr3"], Hp, _round_up(R, LANE)), br3=bpad(params["br3"], _round_up(R, LANE)),
    )
    dims = dict(L=L, H=H, R=R, Lp=Lp, Hp=Hp, W=W)
    return packed, dims


def _select_batch_tile(B, max_tile=BATCH_TILE):
    """Large tiles to amortize grid-step overhead; >=2 steps once B allows it (v7x megacore)."""
    half = _round_up((B + 1) // 2, 8)
    return max(8, min(max_tile, half))


def conditional_prior_forward(s, eps, packed, dims, batch_tile=None):
    """Run the fused ConditionalPrior forward. Returns dict matching the torch module."""
    B, L_in = s.shape
    L, R, Lp, W = dims["L"], dims["R"], dims["Lp"], dims["W"]

    if batch_tile is None:
        batch_tile = _select_batch_tile(B)
    num_tiles = -(-B // batch_tile)
    Bp = num_tiles * batch_tile

    # pad batch rows / feature lanes with zeros (padded rows & lanes sliced away below)
    s_p = jnp.zeros((Bp, Lp), jnp.float32).at[:B, :L_in].set(s)
    eps_p = jnp.zeros((Bp, Lp), jnp.float32).at[:B, :L_in].set(eps)

    weight_order = ("w1", "b1", "w2", "b2", "whead", "bhead",
                    "wr1", "br1", "wr2", "br2", "wr3", "br3")
    weights = [packed[k] for k in weight_order]

    def tile_spec(width):
        return pl.BlockSpec((batch_tile, width), lambda i: (i, 0))

    kernel = functools.partial(conditional_prior_kernel, L=L, R=R, Lp=Lp)

    def run(weight_specs):
        return pl.pallas_call(
            kernel,
            out_shape=jax.ShapeDtypeStruct((Bp, W), jnp.float32),
            grid=(num_tiles,),
            in_specs=[tile_spec(Lp), tile_spec(Lp)] + weight_specs,
            out_specs=tile_spec(W),
            compiler_params=pltpu.CompilerParams(
                dimension_semantics=("parallel",),     # megacore sharding on v7x
                vmem_limit_bytes=32 * 1024 * 1024,     # lifts v5e default; safe on 64 MiB v7x
            ),
        )(s_p, eps_p, *weights)

    try:
        # Constant index_map -> weights DMA'd once; single-buffer them to free VMEM
        # headroom and trim per-step bookkeeping.
        weight_specs = [pl.BlockSpec(w.shape, lambda i: (0, 0),
                                     pipeline_mode=pl.Buffered(1)) for w in weights]
        packed_out = run(weight_specs)
    except Exception:
        # Fallback: default (double-buffered) weight specs if Buffered(1) is unsupported.
        weight_specs = [pl.BlockSpec(w.shape, lambda i: (0, 0)) for w in weights]
        packed_out = run(weight_specs)

    rec = packed_out[:B, 0:R]
    mean = packed_out[:B, R:R + L]
    var = packed_out[:B, R + L:R + 2 * L]
    z = packed_out[:B, R + 2 * L:R + 3 * L]
    return {"rec": rec, "z_mean": mean, "z_var": var, "z_prior": z}


def init_params(key, input_dim, latent_dim, hidden_dim, rec_dim=None):
    """Deterministic PyTorch-Linear-style uniform init; weights stored as [in, out]."""
    rec_dim = rec_dim if rec_dim is not None else input_dim

    def linear(k, fan_in, fan_out):
        kw, kb = jax.random.split(k)
        bound = 1.0 / jnp.sqrt(fan_in)
        w = jax.random.uniform(kw, (fan_in, fan_out), jnp.float32, -bound, bound)
        b = jax.random.uniform(kb, (1, fan_out), jnp.float32, -bound, bound)
        return w, b

    keys = jax.random.split(key, 7)
    p = {}
    p["w1"], p["b1"] = linear(keys[0], latent_dim, hidden_dim)
    p["w2"], p["b2"] = linear(keys[1], hidden_dim, hidden_dim)
    p["wmu"], p["bmu"] = linear(keys[2], hidden_dim, latent_dim)
    p["wvar"], p["bvar"] = linear(keys[3], hidden_dim, latent_dim)
    p["wr1"], p["br1"] = linear(keys[4], latent_dim, hidden_dim)
    p["wr2"], p["br2"] = linear(keys[5], hidden_dim, hidden_dim)
    p["wr3"], p["br3"] = linear(keys[6], hidden_dim, rec_dim)
    return p


def reference_forward(s, eps, p, matmul_dtype=jnp.float32):
    """Plain-JAX reference. matmul_dtype=bf16 mirrors the kernel's bf16-input matmuls."""
    cast = lambda x: x.astype(matmul_dtype)
    dot = lambda a, b: jnp.dot(cast(a), cast(b), preferred_element_type=jnp.float32)
    relu = lambda x: jnp.maximum(x, 0.0)
    h = relu(dot(s, p["w1"]) + p["b1"])
    h = relu(dot(h, p["w2"]) + p["b2"])
    mean = dot(h, p["wmu"]) + p["bmu"]
    var = _softplus(dot(h, p["wvar"]) + p["bvar"])
    z = mean + eps * jnp.sqrt(var + 1e-10)
    r = relu(dot(z, p["wr1"]) + p["br1"])
    r = relu(dot(r, p["wr2"]) + p["br2"])
    logits = dot(r, p["wr3"]) + p["br3"]
    rec = 1.0 / (1.0 + jnp.exp(-logits))
    return {"rec": rec, "z_mean": mean, "z_var": var, "z_prior": z}


if __name__ == "__main__":
    # Small shapes consistent with the module's forward:
    #   s: [batch, latent_dim]  ->  rec: [batch, rec_dim(=input_dim)]
    batch, input_dim, latent_dim, hidden_dim = 8, 16, 16, 32

    root = jax.random.PRNGKey(0)
    k_params, k_s, k_eps = jax.random.split(root, 3)

    params = init_params(k_params, input_dim, latent_dim, hidden_dim)
    s = jax.random.normal(k_s, (batch, latent_dim), dtype=jnp.float32)
    # reparameterization noise (torch.randn_like equivalent), generated as glue in plain JAX
    eps = jax.random.normal(k_eps, (batch, latent_dim), dtype=jnp.float32)

    packed, dims = pack_params(params)
    out = conditional_prior_forward(s, eps, packed, dims)
    jax.block_until_ready(out)

    # shape / range sanity
    assert out["rec"].shape == (batch, input_dim)
    assert out["z_mean"].shape == (batch, latent_dim)
    assert out["z_var"].shape == (batch, latent_dim)
    assert out["z_prior"].shape == (batch, latent_dim)
    assert bool(jnp.all(out["z_var"] > 0.0))
    assert bool(jnp.all((out["rec"] >= 0.0) & (out["rec"] <= 1.0)))

    # tight agreement with a reference that uses the same bf16 matmul inputs
    ref_bf16 = reference_forward(s, eps, params, matmul_dtype=jnp.bfloat16)
    for key in ("rec", "z_mean", "z_var", "z_prior"):
        assert bool(jnp.allclose(out[key], ref_bf16[key], atol=2e-3, rtol=2e-3)), key

    # looser agreement with the pure-f32 reference (bf16 input rounding across 7 layers)
    ref_f32 = reference_forward(s, eps, params, matmul_dtype=jnp.float32)
    for key in ("rec", "z_mean", "z_var", "z_prior"):
        assert bool(jnp.allclose(out[key], ref_f32[key], atol=5e-2, rtol=5e-2)), key

    print("KERNEL_OK")
</pallas_src>

<mosaic_0001>
module attributes {stable_mosaic.version = 11 : i64} {
  func.func @conditional_prior_kernel(%arg0: i32, %arg1: memref<8x128xf32, #tpu.memory_space<vmem>>, %arg2: memref<8x128xf32, #tpu.memory_space<vmem>>, %arg3: memref<128x128xbf16, #tpu.memory_space<vmem>>, %arg4: memref<1x128xf32, #tpu.memory_space<vmem>>, %arg5: memref<128x128xbf16, #tpu.memory_space<vmem>>, %arg6: memref<1x128xf32, #tpu.memory_space<vmem>>, %arg7: memref<128x256xbf16, #tpu.memory_space<vmem>>, %arg8: memref<1x256xf32, #tpu.memory_space<vmem>>, %arg9: memref<128x128xbf16, #tpu.memory_space<vmem>>, %arg10: memref<1x128xf32, #tpu.memory_space<vmem>>, %arg11: memref<128x128xbf16, #tpu.memory_space<vmem>>, %arg12: memref<1x128xf32, #tpu.memory_space<vmem>>, %arg13: memref<128x128xbf16, #tpu.memory_space<vmem>>, %arg14: memref<1x128xf32, #tpu.memory_space<vmem>>, %arg15: memref<8x128xf32, #tpu.memory_space<vmem>>) attributes {dimension_semantics = [#tpu.dimension_semantics<parallel>], iteration_bounds = array<i64: 1>, scalar_prefetch = 0 : i64, scratch_operands = 0 : i64, tpu.core_type = #tpu.core_type<tc>, window_params = [{transform_indices = @transform_0, window_bounds = array<i64: 8, 128>}, {transform_indices = @transform_1, window_bounds = array<i64: 8, 128>}, {pipeline_mode = #tpu.pipeline_mode<synchronous>, transform_indices = @transform_2, window_bounds = array<i64: 128, 128>}, {pipeline_mode = #tpu.pipeline_mode<synchronous>, transform_indices = @transform_3, window_bounds = array<i64: 1, 128>}, {pipeline_mode = #tpu.pipeline_mode<synchronous>, transform_indices = @transform_4, window_bounds = array<i64: 128, 128>}, {pipeline_mode = #tpu.pipeline_mode<synchronous>, transform_indices = @transform_5, window_bounds = array<i64: 1, 128>}, {pipeline_mode = #tpu.pipeline_mode<synchronous>, transform_indices = @transform_6, window_bounds = array<i64: 128, 256>}, {pipeline_mode = #tpu.pipeline_mode<synchronous>, transform_indices = @transform_7, window_bounds = array<i64: 1, 256>}, {pipeline_mode = #tpu.pipeline_mode<synchronous>, transform_indices = @transform_8, window_bounds = array<i64: 128, 128>}, {pipeline_mode = #tpu.pipeline_mode<synchronous>, transform_indices = @transform_9, window_bounds = array<i64: 1, 128>}, {pipeline_mode = #tpu.pipeline_mode<synchronous>, transform_indices = @transform_10, window_bounds = array<i64: 128, 128>}, {pipeline_mode = #tpu.pipeline_mode<synchronous>, transform_indices = @transform_11, window_bounds = array<i64: 1, 128>}, {pipeline_mode = #tpu.pipeline_mode<synchronous>, transform_indices = @transform_12, window_bounds = array<i64: 128, 128>}, {pipeline_mode = #tpu.pipeline_mode<synchronous>, transform_indices = @transform_13, window_bounds = array<i64: 1, 128>}, {transform_indices = @transform_14, window_bounds = array<i64: 8, 128>}]} {
    %c0 = arith.constant 0 : index
    %c0_0 = arith.constant 0 : index
    %0 = vector.load %arg1[%c0, %c0_0] : memref<8x128xf32, #tpu.memory_space<vmem>>, vector<8x128xf32>
    %1 = arith.truncf %0 : vector<8x128xf32> to vector<8x128xbf16>
    %c0_1 = arith.constant 0 : index
    %c0_2 = arith.constant 0 : index
    %2 = vector.load %arg3[%c0_1, %c0_2] : memref<128x128xbf16, #tpu.memory_space<vmem>>, vector<128x128xbf16>
    %cst = arith.constant dense<0.000000e+00> : vector<8x128xf32>
    %3 = tpu.matmul %1, %2, %cst {dimension_numbers = #tpu.dot_dimension_numbers<[1], [0], [0], [1], [0, 0, 1, 1], [], []>} : vector<8x128xbf16>, vector<128x128xbf16>, vector<8x128xf32> -> vector<8x128xf32>
    %c0_3 = arith.constant 0 : index
    %c0_4 = arith.constant 0 : index
    %4 = vector.load %arg4[%c0_3, %c0_4] : memref<1x128xf32, #tpu.memory_space<vmem>>, vector<1x128xf32>
    %5 = vector.broadcast %4 : vector<1x128xf32> to vector<8x128xf32>
    %6 = arith.addf %3, %5 : vector<8x128xf32>
    %cst_5 = arith.constant 0.000000e+00 : f32
    %7 = vector.broadcast %cst_5 : f32 to vector<8x128xf32>
    %8 = arith.maximumf %6, %7 : vector<8x128xf32>
    %9 = arith.truncf %8 : vector<8x128xf32> to vector<8x128xbf16>
    %c0_6 = arith.constant 0 : index
    %c0_7 = arith.constant 0 : index
    %10 = vector.load %arg5[%c0_6, %c0_7] : memref<128x128xbf16, #tpu.memory_space<vmem>>, vector<128x128xbf16>
    %cst_8 = arith.constant dense<0.000000e+00> : vector<8x128xf32>
    %11 = tpu.matmul %9, %10, %cst_8 {dimension_numbers = #tpu.dot_dimension_numbers<[1], [0], [0], [1], [0, 0, 1, 1], [], []>} : vector<8x128xbf16>, vector<128x128xbf16>, vector<8x128xf32> -> vector<8x128xf32>
    %c0_9 = arith.constant 0 : index
    %c0_10 = arith.constant 0 : index
    %12 = vector.load %arg6[%c0_9, %c0_10] : memref<1x128xf32, #tpu.memory_space<vmem>>, vector<1x128xf32>
    %13 = vector.broadcast %12 : vector<1x128xf32> to vector<8x128xf32>
    %14 = arith.addf %11, %13 : vector<8x128xf32>
    %cst_11 = arith.constant 0.000000e+00 : f32
    %15 = vector.broadcast %cst_11 : f32 to vector<8x128xf32>
    %16 = arith.maximumf %14, %15 : vector<8x128xf32>
    %17 = arith.truncf %16 : vector<8x128xf32> to vector<8x128xbf16>
    %c0_12 = arith.constant 0 : index
    %c0_13 = arith.constant 0 : index
    %18 = vector.load %arg7[%c0_12, %c0_13] : memref<128x256xbf16, #tpu.memory_space<vmem>>, vector<128x256xbf16>
    %cst_14 = arith.constant dense<0.000000e+00> : vector<8x256xf32>
    %19 = tpu.matmul %17, %18, %cst_14 {dimension_numbers = #tpu.dot_dimension_numbers<[1], [0], [0], [1], [0, 0, 1, 1], [], []>} : vector<8x128xbf16>, vector<128x256xbf16>, vector<8x256xf32> -> vector<8x256xf32>
    %c0_15 = arith.constant 0 : index
    %c0_16 = arith.constant 0 : index
    %20 = vector.load %arg8[%c0_15, %c0_16] : memref<1x256xf32, #tpu.memory_space<vmem>>, vector<1x256xf32>
    %21 = vector.broadcast %20 : vector<1x256xf32> to vector<8x256xf32>
    %22 = arith.addf %19, %21 : vector<8x256xf32>
    %23 = vector.extract_strided_slice %22 {offsets = [0, 0], sizes = [8, 128], strides = [1, 1]} : vector<8x256xf32> to vector<8x128xf32>
    %24 = vector.extract_strided_slice %22 {offsets = [0, 128], sizes = [8, 128], strides = [1, 1]} : vector<8x256xf32> to vector<8x128xf32>
    %cst_17 = arith.constant 0.000000e+00 : f32
    %25 = vector.broadcast %cst_17 : f32 to vector<8x128xf32>
    %26 = arith.maximumf %24, %25 : vector<8x128xf32>
    %27 = math.absf %24 : vector<8x128xf32>
    %cst_18 = arith.constant 0.000000e+00 : f32
    %28 = vector.broadcast %cst_18 : f32 to vector<8x128xf32>
    %29 = arith.subf %28, %27 : vector<8x128xf32>
    %30 = math.exp %29 : vector<8x128xf32>
    %31 = math.log1p %30 : vector<8x128xf32>
    %32 = arith.addf %26, %31 : vector<8x128xf32>
    %c0_19 = arith.constant 0 : index
    %c0_20 = arith.constant 0 : index
    %33 = vector.load %arg2[%c0_19, %c0_20] : memref<8x128xf32, #tpu.memory_space<vmem>>, vector<8x128xf32>
    %cst_21 = arith.constant 1.000000e-10 : f32
    %34 = vector.broadcast %cst_21 : f32 to vector<8x128xf32>
    %35 = arith.addf %32, %34 : vector<8x128xf32>
    %36 = math.sqrt %35 : vector<8x128xf32>
    %37 = arith.mulf %33, %36 : vector<8x128xf32>
    %38 = arith.addf %23, %37 : vector<8x128xf32>
    %39 = arith.truncf %38 : vector<8x128xf32> to vector<8x128xbf16>
    %c0_22 = arith.constant 0 : index
    %c0_23 = arith.constant 0 : index
    %40 = vector.load %arg9[%c0_22, %c0_23] : memref<128x128xbf16, #tpu.memory_space<vmem>>, vector<128x128xbf16>
    %cst_24 = arith.constant dense<0.000000e+00> : vector<8x128xf32>
    %41 = tpu.matmul %39, %40, %cst_24 {dimension_numbers = #tpu.dot_dimension_numbers<[1], [0], [0], [1], [0, 0, 1, 1], [], []>} : vector<8x128xbf16>, vector<128x128xbf16>, vector<8x128xf32> -> vector<8x128xf32>
    %c0_25 = arith.constant 0 : index
    %c0_26 = arith.constant 0 : index
    %42 = vector.load %arg10[%c0_25, %c0_26] : memref<1x128xf32, #tpu.memory_space<vmem>>, vector<1x128xf32>
    %43 = vector.broadcast %42 : vector<1x128xf32> to vector<8x128xf32>
    %44 = arith.addf %41, %43 : vector<8x128xf32>
    %cst_27 = arith.constant 0.000000e+00 : f32
    %45 = vector.broadcast %cst_27 : f32 to vector<8x128xf32>
    %46 = arith.maximumf %44, %45 : vector<8x128xf32>
    %47 = arith.truncf %46 : vector<8x128xf32> to vector<8x128xbf16>
    %c0_28 = arith.constant 0 : index
    %c0_29 = arith.constant 0 : index
    %48 = vector.load %arg11[%c0_28, %c0_29] : memref<128x128xbf16, #tpu.memory_space<vmem>>, vector<128x128xbf16>
    %cst_30 = arith.constant dense<0.000000e+00> : vector<8x128xf32>
    %49 = tpu.matmul %47, %48, %cst_30 {dimension_numbers = #tpu.dot_dimension_numbers<[1], [0], [0], [1], [0, 0, 1, 1], [], []>} : vector<8x128xbf16>, vector<128x128xbf16>, vector<8x128xf32> -> vector<8x128xf32>
    %c0_31 = arith.constant 0 : index
    %c0_32 = arith.constant 0 : index
    %50 = vector.load %arg12[%c0_31, %c0_32] : memref<1x128xf32, #tpu.memory_space<vmem>>, vector<1x128xf32>
    %51 = vector.broadcast %50 : vector<1x128xf32> to vector<8x128xf32>
    %52 = arith.addf %49, %51 : vector<8x128xf32>
    %cst_33 = arith.constant 0.000000e+00 : f32
    %53 = vector.broadcast %cst_33 : f32 to vector<8x128xf32>
    %54 = arith.maximumf %52, %53 : vector<8x128xf32>
    %55 = arith.truncf %54 : vector<8x128xf32> to vector<8x128xbf16>
    %c0_34 = arith.constant 0 : index
    %c0_35 = arith.constant 0 : index
    %56 = vector.load %arg13[%c0_34, %c0_35] : memref<128x128xbf16, #tpu.memory_space<vmem>>, vector<128x128xbf16>
    %cst_36 = arith.constant dense<0.000000e+00> : vector<8x128xf32>
    %57 = tpu.matmul %55, %56, %cst_36 {dimension_numbers = #tpu.dot_dimension_numbers<[1], [0], [0], [1], [0, 0, 1, 1], [], []>} : vector<8x128xbf16>, vector<128x128xbf16>, vector<8x128xf32> -> vector<8x128xf32>
    %c0_37 = arith.constant 0 : index
    %c0_38 = arith.constant 0 : index
    %58 = vector.load %arg14[%c0_37, %c0_38] : memref<1x128xf32, #tpu.memory_space<vmem>>, vector<1x128xf32>
    %59 = vector.broadcast %58 : vector<1x128xf32> to vector<8x128xf32>
    %60 = arith.addf %57, %59 : vector<8x128xf32>
    %cst_39 = arith.constant 0.000000e+00 : f32
    %61 = vector.broadcast %cst_39 : f32 to vector<8x128xf32>
    %62 = arith.subf %61, %60 : vector<8x128xf32>
    %63 = math.exp %62 : vector<8x128xf32>
    %cst_40 = arith.constant 1.000000e+00 : f32
    %64 = vector.broadcast %cst_40 : f32 to vector<8x128xf32>
    %65 = arith.addf %64, %63 : vector<8x128xf32>
    %66 = tpu.reciprocal %65 {approx = true} : vector<8x128xf32> -> vector<8x128xf32>
    %cst_41 = arith.constant 0.000000e+00 : f32
    %cst_42 = arith.constant 1.000000e+00 : f32
    %67 = vector.broadcast %cst_41 : f32 to vector<8x128xf32>
    %68 = arith.maximumf %67, %66 : vector<8x128xf32>
    %69 = vector.broadcast %cst_42 : f32 to vector<8x128xf32>
    %70 = arith.minimumf %69, %68 : vector<8x128xf32>
    %71 = vector.extract_strided_slice %70 {offsets = [0, 0], sizes = [8, 16], strides = [1, 1]} : vector<8x128xf32> to vector<8x16xf32>
    %72 = vector.extract_strided_slice %23 {offsets = [0, 0], sizes = [8, 16], strides = [1, 1]} : vector<8x128xf32> to vector<8x16xf32>
    %73 = vector.extract_strided_slice %32 {offsets = [0, 0], sizes = [8, 16], strides = [1, 1]} : vector<8x128xf32> to vector<8x16xf32>
    %74 = vector.extract_strided_slice %38 {offsets = [0, 0], sizes = [8, 16], strides = [1, 1]} : vector<8x128xf32> to vector<8x16xf32>
    %cst_43 = arith.constant 0.000000e+00 : f32
    %75 = vector.broadcast %cst_43 : f32 to vector<8x64xf32>
    %76 = tpu.concatenate %71, %72, %73, %74, %75 in 1 : vector<8x16xf32>, vector<8x16xf32>, vector<8x16xf32>, vector<8x16xf32>, vector<8x64xf32> -> vector<8x128xf32>
    %c0_44 = arith.constant 0 : index
    %c0_45 = arith.constant 0 : index
    %77 = vector.load %arg15[%c0_44, %c0_45] : memref<8x128xf32, #tpu.memory_space<vmem>>, vector<8x128xf32>
    tpu.vector_store %arg15[%c0_44, %c0_45], %76 {strides = array<i32>} : memref<8x128xf32, #tpu.memory_space<vmem>>, vector<8x128xf32>,
    return
  }
  func.func @transform_0(%arg0: i32) -> (i32, i32) {
    %c0_i32 = arith.constant 0 : i32
    %c0_i32_0 = arith.constant 0 : i32
    return %arg0, %c0_i32 : i32, i32
  }
  func.func @transform_1(%arg0: i32) -> (i32, i32) {
    %c0_i32 = arith.constant 0 : i32
    %c0_i32_0 = arith.constant 0 : i32
    return %arg0, %c0_i32 : i32, i32
  }
  func.func @transform_2(%arg0: i32) -> (i32, i32) {
    %c0_i32 = arith.constant 0 : i32
    %c0_i32_0 = arith.constant 0 : i32
    %c0_i32_1 = arith.constant 0 : i32
    return %c0_i32, %c0_i32_0 : i32, i32
  }
  func.func @transform_3(%arg0: i32) -> (i32, i32) {
    %c0_i32 = arith.constant 0 : i32
    %c0_i32_0 = arith.constant 0 : i32
    %c0_i32_1 = arith.constant 0 : i32
    return %c0_i32, %c0_i32_0 : i32, i32
  }
  func.func @transform_4(%arg0: i32) -> (i32, i32) {
    %c0_i32 = arith.constant 0 : i32
    %c0_i32_0 = arith.constant 0 : i32
    %c0_i32_1 = arith.constant 0 : i32
    return %c0_i32, %c0_i32_0 : i32, i32
  }
  func.func @transform_5(%arg0: i32) -> (i32, i32) {
    %c0_i32 = arith.constant 0 : i32
    %c0_i32_0 = arith.constant 0 : i32
    %c0_i32_1 = arith.constant 0 : i32
    return %c0_i32, %c0_i32_0 : i32, i32
  }
  func.func @transform_6(%arg0: i32) -> (i32, i32) {
    %c0_i32 = arith.constant 0 : i32
    %c0_i32_0 = arith.constant 0 : i32
    %c0_i32_1 = arith.constant 0 : i32
    return %c0_i32, %c0_i32_0 : i32, i32
  }
  func.func @transform_7(%arg0: i32) -> (i32, i32) {
    %c0_i32 = arith.constant 0 : i32
    %c0_i32_0 = arith.constant 0 : i32
    %c0_i32_1 = arith.constant 0 : i32
    return %c0_i32, %c0_i32_0 : i32, i32
  }
  func.func @transform_8(%arg0: i32) -> (i32, i32) {
    %c0_i32 = arith.constant 0 : i32
    %c0_i32_0 = arith.constant 0 : i32
    %c0_i32_1 = arith.constant 0 : i32
    return %c0_i32, %c0_i32_0 : i32, i32
  }
  func.func @transform_9(%arg0: i32) -> (i32, i32) {
    %c0_i32 = arith.constant 0 : i32
    %c0_i32_0 = arith.constant 0 : i32
    %c0_i32_1 = arith.constant 0 : i32
    return %c0_i32, %c0_i32_0 : i32, i32
  }
  func.func @transform_10(%arg0: i32) -> (i32, i32) {
    %c0_i32 = arith.constant 0 : i32
    %c0_i32_0 = arith.constant 0 : i32
    %c0_i32_1 = arith.constant 0 : i32
    return %c0_i32, %c0_i32_0 : i32, i32
  }
  func.func @transform_11(%arg0: i32) -> (i32, i32) {
    %c0_i32 = arith.constant 0 : i32
    %c0_i32_0 = arith.constant 0 : i32
    %c0_i32_1 = arith.constant 0 : i32
    return %c0_i32, %c0_i32_0 : i32, i32
  }
  func.func @transform_12(%arg0: i32) -> (i32, i32) {
    %c0_i32 = arith.constant 0 : i32
    %c0_i32_0 = arith.constant 0 : i32
    %c0_i32_1 = arith.constant 0 : i32
    return %c0_i32, %c0_i32_0 : i32, i32
  }
  func.func @transform_13(%arg0: i32) -> (i32, i32) {
    %c0_i32 = arith.constant 0 : i32
    %c0_i32_0 = arith.constant 0 : i32
    %c0_i32_1 = arith.constant 0 : i32
    return %c0_i32, %c0_i32_0 : i32, i32
  }
  func.func @transform_14(%arg0: i32) -> (i32, i32) {
    %c0_i32 = arith.constant 0 : i32
    %c0_i32_0 = arith.constant 0 : i32
    return %arg0, %c0_i32 : i32, i32
  }
}

module attributes {stable_mosaic.version = 11 : i64} {
  func.func @conditional_prior_kernel(%arg0: i32, %arg1: memref<8x128xf32, #tpu.memory_space<vmem>>, %arg2: memref<8x128xf32, #tpu.memory_space<vmem>>, %arg3: memref<128x128xbf16, #tpu.memory_space<vmem>>, %arg4: memref<1x128xf32, #tpu.memory_space<vmem>>, %arg5: memref<128x128xbf16, #tpu.memory_space<vmem>>, %arg6: memref<1x128xf32, #tpu.memory_space<vmem>>, %arg7: memref<128x256xbf16, #tpu.memory_space<vmem>>, %arg8: memref<1x256xf32, #tpu.memory_space<vmem>>, %arg9: memref<128x128xbf16, #tpu.memory_space<vmem>>, %arg10: memref<1x128xf32, #tpu.memory_space<vmem>>, %arg11: memref<128x128xbf16, #tpu.memory_space<vmem>>, %arg12: memref<1x128xf32, #tpu.memory_space<vmem>>, %arg13: memref<128x128xbf16, #tpu.memory_space<vmem>>, %arg14: memref<1x128xf32, #tpu.memory_space<vmem>>, %arg15: memref<8x128xf32, #tpu.memory_space<vmem>>) attributes {dimension_semantics = [#tpu.dimension_semantics<parallel>], iteration_bounds = array<i64: 1>, scalar_prefetch = 0 : i64, scratch_operands = 0 : i64, tpu.core_type = #tpu.core_type<tc>, window_params = [{transform_indices = @transform_0, window_bounds = array<i64: 8, 128>}, {transform_indices = @transform_1, window_bounds = array<i64: 8, 128>}, {pipeline_mode = #tpu.pipeline_mode<synchronous>, transform_indices = @transform_2, window_bounds = array<i64: 128, 128>}, {pipeline_mode = #tpu.pipeline_mode<synchronous>, transform_indices = @transform_3, window_bounds = array<i64: 1, 128>}, {pipeline_mode = #tpu.pipeline_mode<synchronous>, transform_indices = @transform_4, window_bounds = array<i64: 128, 128>}, {pipeline_mode = #tpu.pipeline_mode<synchronous>, transform_indices = @transform_5, window_bounds = array<i64: 1, 128>}, {pipeline_mode = #tpu.pipeline_mode<synchronous>, transform_indices = @transform_6, window_bounds = array<i64: 128, 256>}, {pipeline_mode = #tpu.pipeline_mode<synchronous>, transform_indices = @transform_7, window_bounds = array<i64: 1, 256>}, {pipeline_mode = #tpu.pipeline_mode<synchronous>, transform_indices = @transform_8, window_bounds = array<i64: 128, 128>}, {pipeline_mode = #tpu.pipeline_mode<synchronous>, transform_indices = @transform_9, window_bounds = array<i64: 1, 128>}, {pipeline_mode = #tpu.pipeline_mode<synchronous>, transform_indices = @transform_10, window_bounds = array<i64: 128, 128>}, {pipeline_mode = #tpu.pipeline_mode<synchronous>, transform_indices = @transform_11, window_bounds = array<i64: 1, 128>}, {pipeline_mode = #tpu.pipeline_mode<synchronous>, transform_indices = @transform_12, window_bounds = array<i64: 128, 128>}, {pipeline_mode = #tpu.pipeline_mode<synchronous>, transform_indices = @transform_13, window_bounds = array<i64: 1, 128>}, {transform_indices = @transform_14, window_bounds = array<i64: 8, 128>}]} {
    %c0 = arith.constant 0 : index
    %c0_0 = arith.constant 0 : index
    %0 = vector.load %arg1[%c0, %c0_0] : memref<8x128xf32, #tpu.memory_space<vmem>>, vector<8x128xf32>
    %1 = arith.truncf %0 : vector<8x128xf32> to vector<8x128xbf16>
    %c0_1 = arith.constant 0 : index
    %c0_2 = arith.constant 0 : index
    %2 = vector.load %arg3[%c0_1, %c0_2] : memref<128x128xbf16, #tpu.memory_space<vmem>>, vector<128x128xbf16>
    %cst = arith.constant dense<0.000000e+00> : vector<8x128xf32>
    %3 = tpu.matmul %1, %2, %cst {dimension_numbers = #tpu.dot_dimension_numbers<[1], [0], [0], [1], [0, 0, 1, 1], [], []>} : vector<8x128xbf16>, vector<128x128xbf16>, vector<8x128xf32> -> vector<8x128xf32>
    %c0_3 = arith.constant 0 : index
    %c0_4 = arith.constant 0 : index
    %4 = vector.load %arg4[%c0_3, %c0_4] : memref<1x128xf32, #tpu.memory_space<vmem>>, vector<1x128xf32>
    %5 = vector.broadcast %4 : vector<1x128xf32> to vector<8x128xf32>
    %6 = arith.addf %3, %5 : vector<8x128xf32>
    %cst_5 = arith.constant 0.000000e+00 : f32
    %7 = vector.broadcast %cst_5 : f32 to vector<8x128xf32>
    %8 = arith.maximumf %6, %7 : vector<8x128xf32>
    %9 = arith.truncf %8 : vector<8x128xf32> to vector<8x128xbf16>
    %c0_6 = arith.constant 0 : index
    %c0_7 = arith.constant 0 : index
    %10 = vector.load %arg5[%c0_6, %c0_7] : memref<128x128xbf16, #tpu.memory_space<vmem>>, vector<128x128xbf16>
    %cst_8 = arith.constant dense<0.000000e+00> : vector<8x128xf32>
    %11 = tpu.matmul %9, %10, %cst_8 {dimension_numbers = #tpu.dot_dimension_numbers<[1], [0], [0], [1], [0, 0, 1, 1], [], []>} : vector<8x128xbf16>, vector<128x128xbf16>, vector<8x128xf32> -> vector<8x128xf32>
    %c0_9 = arith.constant 0 : index
    %c0_10 = arith.constant 0 : index
    %12 = vector.load %arg6[%c0_9, %c0_10] : memref<1x128xf32, #tpu.memory_space<vmem>>, vector<1x128xf32>
    %13 = vector.broadcast %12 : vector<1x128xf32> to vector<8x128xf32>
    %14 = arith.addf %11, %13 : vector<8x128xf32>
    %cst_11 = arith.constant 0.000000e+00 : f32
    %15 = vector.broadcast %cst_11 : f32 to vector<8x128xf32>
    %16 = arith.maximumf %14, %15 : vector<8x128xf32>
    %17 = arith.truncf %16 : vector<8x128xf32> to vector<8x128xbf16>
    %c0_12 = arith.constant 0 : index
    %c0_13 = arith.constant 0 : index
    %18 = vector.load %arg7[%c0_12, %c0_13] : memref<128x256xbf16, #tpu.memory_space<vmem>>, vector<128x256xbf16>
    %cst_14 = arith.constant dense<0.000000e+00> : vector<8x256xf32>
    %19 = tpu.matmul %17, %18, %cst_14 {dimension_numbers = #tpu.dot_dimension_numbers<[1], [0], [0], [1], [0, 0, 1, 1], [], []>} : vector<8x128xbf16>, vector<128x256xbf16>, vector<8x256xf32> -> vector<8x256xf32>
    %c0_15 = arith.constant 0 : index
    %c0_16 = arith.constant 0 : index
    %20 = vector.load %arg8[%c0_15, %c0_16] : memref<1x256xf32, #tpu.memory_space<vmem>>, vector<1x256xf32>
    %21 = vector.broadcast %20 : vector<1x256xf32> to vector<8x256xf32>
    %22 = arith.addf %19, %21 : vector<8x256xf32>
    %23 = vector.extract_strided_slice %22 {offsets = [0, 0], sizes = [8, 128], strides = [1, 1]} : vector<8x256xf32> to vector<8x128xf32>
    %24 = vector.extract_strided_slice %22 {offsets = [0, 128], sizes = [8, 128], strides = [1, 1]} : vector<8x256xf32> to vector<8x128xf32>
    %cst_17 = arith.constant 0.000000e+00 : f32
    %25 = vector.broadcast %cst_17 : f32 to vector<8x128xf32>
    %26 = arith.maximumf %24, %25 : vector<8x128xf32>
    %27 = math.absf %24 : vector<8x128xf32>
    %cst_18 = arith.constant 0.000000e+00 : f32
    %28 = vector.broadcast %cst_18 : f32 to vector<8x128xf32>
    %29 = arith.subf %28, %27 : vector<8x128xf32>
    %30 = math.exp %29 : vector<8x128xf32>
    %31 = math.log1p %30 : vector<8x128xf32>
    %32 = arith.addf %26, %31 : vector<8x128xf32>
    %c0_19 = arith.constant 0 : index
    %c0_20 = arith.constant 0 : index
    %33 = vector.load %arg2[%c0_19, %c0_20] : memref<8x128xf32, #tpu.memory_space<vmem>>, vector<8x128xf32>
    %cst_21 = arith.constant 1.000000e-10 : f32
    %34 = vector.broadcast %cst_21 : f32 to vector<8x128xf32>
    %35 = arith.addf %32, %34 : vector<8x128xf32>
    %36 = math.sqrt %35 : vector<8x128xf32>
    %37 = arith.mulf %33, %36 : vector<8x128xf32>
    %38 = arith.addf %23, %37 : vector<8x128xf32>
    %39 = arith.truncf %38 : vector<8x128xf32> to vector<8x128xbf16>
    %c0_22 = arith.constant 0 : index
    %c0_23 = arith.constant 0 : index
    %40 = vector.load %arg9[%c0_22, %c0_23] : memref<128x128xbf16, #tpu.memory_space<vmem>>, vector<128x128xbf16>
    %cst_24 = arith.constant dense<0.000000e+00> : vector<8x128xf32>
    %41 = tpu.matmul %39, %40, %cst_24 {dimension_numbers = #tpu.dot_dimension_numbers<[1], [0], [0], [1], [0, 0, 1, 1], [], []>} : vector<8x128xbf16>, vector<128x128xbf16>, vector<8x128xf32> -> vector<8x128xf32>
    %c0_25 = arith.constant 0 : index
    %c0_26 = arith.constant 0 : index
    %42 = vector.load %arg10[%c0_25, %c0_26] : memref<1x128xf32, #tpu.memory_space<vmem>>, vector<1x128xf32>
    %43 = vector.broadcast %42 : vector<1x128xf32> to vector<8x128xf32>
    %44 = arith.addf %41, %43 : vector<8x128xf32>
    %cst_27 = arith.constant 0.000000e+00 : f32
    %45 = vector.broadcast %cst_27 : f32 to vector<8x128xf32>
    %46 = arith.maximumf %44, %45 : vector<8x128xf32>
    %47 = arith.truncf %46 : vector<8x128xf32> to vector<8x128xbf16>
    %c0_28 = arith.constant 0 : index
    %c0_29 = arith.constant 0 : index
    %48 = vector.load %arg11[%c0_28, %c0_29] : memref<128x128xbf16, #tpu.memory_space<vmem>>, vector<128x128xbf16>
    %cst_30 = arith.constant dense<0.000000e+00> : vector<8x128xf32>
    %49 = tpu.matmul %47, %48, %cst_30 {dimension_numbers = #tpu.dot_dimension_numbers<[1], [0], [0], [1], [0, 0, 1, 1], [], []>} : vector<8x128xbf16>, vector<128x128xbf16>, vector<8x128xf32> -> vector<8x128xf32>
    %c0_31 = arith.constant 0 : index
    %c0_32 = arith.constant 0 : index
    %50 = vector.load %arg12[%c0_31, %c0_32] : memref<1x128xf32, #tpu.memory_space<vmem>>, vector<1x128xf32>
    %51 = vector.broadcast %50 : vector<1x128xf32> to vector<8x128xf32>
    %52 = arith.addf %49, %51 : vector<8x128xf32>
    %cst_33 = arith.constant 0.000000e+00 : f32
    %53 = vector.broadcast %cst_33 : f32 to vector<8x128xf32>
    %54 = arith.maximumf %52, %53 : vector<8x128xf32>
    %55 = arith.truncf %54 : vector<8x128xf32> to vector<8x128xbf16>
    %c0_34 = arith.constant 0 : index
    %c0_35 = arith.constant 0 : index
    %56 = vector.load %arg13[%c0_34, %c0_35] : memref<128x128xbf16, #tpu.memory_space<vmem>>, vector<128x128xbf16>
    %cst_36 = arith.constant dense<0.000000e+00> : vector<8x128xf32>
    %57 = tpu.matmul %55, %56, %cst_36 {dimension_numbers = #tpu.dot_dimension_numbers<[1], [0], [0], [1], [0, 0, 1, 1], [], []>} : vector<8x128xbf16>, vector<128x128xbf16>, vector<8x128xf32> -> vector<8x128xf32>
    %c0_37 = arith.constant 0 : index
    %c0_38 = arith.constant 0 : index
    %58 = vector.load %arg14[%c0_37, %c0_38] : memref<1x128xf32, #tpu.memory_space<vmem>>, vector<1x128xf32>
    %59 = vector.broadcast %58 : vector<1x128xf32> to vector<8x128xf32>
    %60 = arith.addf %57, %59 : vector<8x128xf32>
    %cst_39 = arith.constant 0.000000e+00 : f32
    %61 = vector.broadcast %cst_39 : f32 to vector<8x128xf32>
    %62 = arith.subf %61, %60 : vector<8x128xf32>
    %63 = math.exp %62 : vector<8x128xf32>
    %cst_40 = arith.constant 1.000000e+00 : f32
    %64 = vector.broadcast %cst_40 : f32 to vector<8x128xf32>
    %65 = arith.addf %64, %63 : vector<8x128xf32>
    %66 = tpu.reciprocal %65 {approx = true} : vector<8x128xf32> -> vector<8x128xf32>
    %cst_41 = arith.constant 0.000000e+00 : f32
    %cst_42 = arith.constant 1.000000e+00 : f32
    %67 = vector.broadcast %cst_41 : f32 to vector<8x128xf32>
    %68 = arith.maximumf %67, %66 : vector<8x128xf32>
    %69 = vector.broadcast %cst_42 : f32 to vector<8x128xf32>
    %70 = arith.minimumf %69, %68 : vector<8x128xf32>
    %71 = vector.extract_strided_slice %70 {offsets = [0, 0], sizes = [8, 16], strides = [1, 1]} : vector<8x128xf32> to vector<8x16xf32>
    %72 = vector.extract_strided_slice %23 {offsets = [0, 0], sizes = [8, 16], strides = [1, 1]} : vector<8x128xf32> to vector<8x16xf32>
    %73 = vector.extract_strided_slice %32 {offsets = [0, 0], sizes = [8, 16], strides = [1, 1]} : vector<8x128xf32> to vector<8x16xf32>
    %74 = vector.extract_strided_slice %38 {offsets = [0, 0], sizes = [8, 16], strides = [1, 1]} : vector<8x128xf32> to vector<8x16xf32>
    %cst_43 = arith.constant 0.000000e+00 : f32
    %75 = vector.broadcast %cst_43 : f32 to vector<8x64xf32>
    %76 = tpu.concatenate %71, %72, %73, %74, %75 in 1 : vector<8x16xf32>, vector<8x16xf32>, vector<8x16xf32>, vector<8x16xf32>, vector<8x64xf32> -> vector<8x128xf32>
    %c0_44 = arith.constant 0 : index
    %c0_45 = arith.constant 0 : index
    %77 = vector.load %arg15[%c0_44, %c0_45] : memref<8x128xf32, #tpu.memory_space<vmem>>, vector<8x128xf32>
    tpu.vector_store %arg15[%c0_44, %c0_45], %76 {strides = array<i32>} : memref<8x128xf32, #tpu.memory_space<vmem>>, vector<8x128xf32>,
    return
  }
  func.func @transform_0(%arg0: i32) -> (i32, i32) {
    %c0_i32 = arith.constant 0 : i32
    %c0_i32_0 = arith.constant 0 : i32
    return %arg0, %c0_i32 : i32, i32
  }
  func.func @transform_1(%arg0: i32) -> (i32, i32) {
    %c0_i32 = arith.constant 0 : i32
    %c0_i32_0 = arith.constant 0 : i32
    return %arg0, %c0_i32 : i32, i32
  }
  func.func @transform_2(%arg0: i32) -> (i32, i32) {
    %c0_i32 = arith.constant 0 : i32
    %c0_i32_0 = arith.constant 0 : i32
    %c0_i32_1 = arith.constant 0 : i32
    return %c0_i32, %c0_i32_0 : i32, i32
  }
  func.func @transform_3(%arg0: i32) -> (i32, i32) {
    %c0_i32 = arith.constant 0 : i32
    %c0_i32_0 = arith.constant 0 : i32
    %c0_i32_1 = arith.constant 0 : i32
    return %c0_i32, %c0_i32_0 : i32, i32
  }
  func.func @transform_4(%arg0: i32) -> (i32, i32) {
    %c0_i32 = arith.constant 0 : i32
    %c0_i32_0 = arith.constant 0 : i32
    %c0_i32_1 = arith.constant 0 : i32
    return %c0_i32, %c0_i32_0 : i32, i32
  }
  func.func @transform_5(%arg0: i32) -> (i32, i32) {
    %c0_i32 = arith.constant 0 : i32
    %c0_i32_0 = arith.constant 0 : i32
    %c0_i32_1 = arith.constant 0 : i32
    return %c0_i32, %c0_i32_0 : i32, i32
  }
  func.func @transform_6(%arg0: i32) -> (i32, i32) {
    %c0_i32 = arith.constant 0 : i32
    %c0_i32_0 = arith.constant 0 : i32
    %c0_i32_1 = arith.constant 0 : i32
    return %c0_i32, %c0_i32_0 : i32, i32
  }
  func.func @transform_7(%arg0: i32) -> (i32, i32) {
    %c0_i32 = arith.constant 0 : i32
    %c0_i32_0 = arith.constant 0 : i32
    %c0_i32_1 = arith.constant 0 : i32
    return %c0_i32, %c0_i32_0 : i32, i32
  }
  func.func @transform_8(%arg0: i32) -> (i32, i32) {
    %c0_i32 = arith.constant 0 : i32
    %c0_i32_0 = arith.constant 0 : i32
    %c0_i32_1 = arith.constant 0 : i32
    return %c0_i32, %c0_i32_0 : i32, i32
  }
  func.func @transform_9(%arg0: i32) -> (i32, i32) {
    %c0_i32 = arith.constant 0 : i32
    %c0_i32_0 = arith.constant 0 : i32
    %c0_i32_1 = arith.constant 0 : i32
    return %c0_i32, %c0_i32_0 : i32, i32
  }
  func.func @transform_10(%arg0: i32) -> (i32, i32) {
    %c0_i32 = arith.constant 0 : i32
    %c0_i32_0 = arith.constant 0 : i32
    %c0_i32_1 = arith.constant 0 : i32
    return %c0_i32, %c0_i32_0 : i32, i32
  }
  func.func @transform_11(%arg0: i32) -> (i32, i32) {
    %c0_i32 = arith.constant 0 : i32
    %c0_i32_0 = arith.constant 0 : i32
    %c0_i32_1 = arith.constant 0 : i32
    return %c0_i32, %c0_i32_0 : i32, i32
  }
  func.func @transform_12(%arg0: i32) -> (i32, i32) {
    %c0_i32 = arith.constant 0 : i32
    %c0_i32_0 = arith.constant 0 : i32
    %c0_i32_1 = arith.constant 0 : i32
    return %c0_i32, %c0_i32_0 : i32, i32
  }
  func.func @transform_13(%arg0: i32) -> (i32, i32) {
    %c0_i32 = arith.constant 0 : i32
    %c0_i32_0 = arith.constant 0 : i32
    %c0_i32_1 = arith.constant 0 : i32
    return %c0_i32, %c0_i32_0 : i32, i32
  }
  func.func @transform_14(%arg0: i32) -> (i32, i32) {
    %c0_i32 = arith.constant 0 : i32
    %c0_i32_0 = arith.constant 0 : i32
    return %arg0, %c0_i32 : i32, i32
  }
}

</mosaic_0001>

<bundles_post_ra>
// kernel: tpu_custom_call.1
= control target key start
LH: loop header
LB: loop body
LE: loop exit
PB: predicated region body
PF: predicated region fallthrough
CT: control target
= control target key end

     0   :  { %19 = vsyncpa [#allocation3], 0  ;;  %s1483_s0 = inlined_call_operand.hbm [shape: f32[8,128], index: 0, kind: input, shape index: {}]   ;;  %s1484_s1 = inlined_call_operand.hbm [shape: f32[8,128], index: 1, kind: input, shape index: {}]   ;;  %s1485_s2 = inlined_call_operand.hbm [shape: bf16[128,128], index: 2, kind: input, shape index: {}]   ;;  %s1486_s3 = inlined_call_operand.vmem [shape: f32[1,128], index: 3, kind: input, shape index: {}]   ;;  %s1487_s4 = inlined_call_operand.hbm [shape: bf16[128,128], index: 4, kind: input, shape index: {}]   ;;  %s1488_s5 = inlined_call_operand.vmem [shape: f32[1,128], index: 5, kind: input, shape index: {}]   ;;  %s1489_s6 = inlined_call_operand.hbm [shape: bf16[128,256], index: 6, kind: input, shape index: {}]   ;;  %s1490_s7 = inlined_call_operand.vmem [shape: f32[1,256], index: 7, kind: input, shape index: {}]   ;;  %s1491_s8 = inlined_call_operand.hbm [shape: bf16[128,128], index: 8, kind: input, shape index: {}]   ;;  %s1492_s9 = inlined_call_operand.vmem [shape: f32[1,128], index: 9, kind: input, shape index: {}]   ;;  %s1493_s10 = inlined_call_operand.hbm [shape: bf16[128,128], index: 10, kind: input, shape index: {}]   ;;  %s1494_s11 = inlined_call_operand.vmem [shape: f32[1,128], index: 11, kind: input, shape index: {}]   ;;  %s1495_s12 = inlined_call_operand.hbm [shape: bf16[128,128], index: 12, kind: input, shape index: {}]   ;;  %s1496_s13 = inlined_call_operand.vmem [shape: f32[1,128], index: 13, kind: input, shape index: {}]   ;;  %s1497_s14 = inlined_call_operand.hbm [shape: f32[8,128], index: 14, kind: output, shape index: {}]  }
   0x1   :  { %20 = vsyncpa [#allocation6], 0 }
   0x2   :  { %21 = vsyncpa [#allocation9], 0 }
   0x3   :  { %22 = vsyncpa [#allocation12], 0 }
   0x4   :  { %23 = vsyncpa [#allocation15], 0  ;;  %s41_s15 = sshll.u32 %s1484_s1, 4  ;;  %s42_s15 = int_to_ptr.hbm [resolvable:$true] %s41_s15 }
   0x5   :  { %24 = vsyncpa [#allocation4], 0  ;;  %s1332_s16 = smov [#allocation5]   ;;  %s66_s20 = sshll.u32 %s1487_s4, 4  ;;  %s67_s20 = int_to_ptr.hbm [resolvable:$true] %s66_s20 }
   0x6   :  { %s43_s17 = sshll.u32 %s1332_s16, 4  ;;  %s1333_s21 = smov [#allocation8]   ;;  %s44_s17 = int_to_ptr.vmem [resolvable:$true] %s43_s17 }
   0x7   :  { %46 = dma.hbm_to_vmem [thread:$0]  %s42_s15, 128, %s44_s17, [#allocation6]  }
   0x8   :  { %s68_s22 = sshll.u32 %s1333_s21, 4  ;;  %s96_s25 = sshll.u32 %s1491_s8, 4  ;;  %s69_s22 = int_to_ptr.vmem [resolvable:$true] %s68_s22  ;;  %s97_s25 = int_to_ptr.hbm [resolvable:$true] %s96_s25 }
   0x9   :  { %s1334_s1 = smov 64   ;;  %s1335_s26 = smov 4  }
   0xa   :  { %74 = dma.hbm_to_vmem [thread:$0]  %s67_s20, 1024, %s69_s22, [#allocation9], %s1334_s1, %s1334_s1, %s1335_s26  }
   0xb   :  { %s30_s29 = sshll.u32 %s1483_s0, 4  ;;  %s1336_s4 = smov [#allocation11]   ;;  %s31_s29 = int_to_ptr.hbm [resolvable:$true] %s30_s29 }
   0xc   :  { %s98_s30 = sshll.u32 %s1336_s4, 4  ;;  %s1337_s8 = smov [#allocation2]   ;;  %s99_s30 = int_to_ptr.vmem [resolvable:$true] %s98_s30 }
   0xd   :  { %104 = dma.hbm_to_vmem [thread:$0]  %s97_s25, 1024, %s99_s30, [#allocation12], %s1334_s1, %s1334_s1, %s1335_s26  }
   0xe   :  { %s32_s15 = sshll.u32 %s1337_s8, 4  ;;  %s51_s18 = sshll.u32 %s1485_s2, 4  ;;  %s33_s15 = int_to_ptr.vmem [resolvable:$true] %s32_s15  ;;  %s52_s18 = int_to_ptr.hbm [resolvable:$true] %s51_s18 }
   0xf   :  { %35 = dma.hbm_to_vmem [thread:$0]  %s31_s29, 128, %s33_s15, [#allocation3]  }
  0x10   :  { %s81_s0 = sshll.u32 %s1489_s6, 4  ;;  %s1338_s21 = smov [#allocation7]   ;;  %s82_s0 = int_to_ptr.hbm [resolvable:$true] %s81_s0 }
  0x11   :  { %s53_s22 = sshll.u32 %s1338_s21, 4  ;;  %s1339_s23 = smov [#allocation10]   ;;  %s54_s22 = int_to_ptr.vmem [resolvable:$true] %s53_s22 }
  0x12   :  { %59 = dma.hbm_to_vmem [thread:$0]  %s52_s18, 1024, %s54_s22, [#allocation6], %s1334_s1, %s1334_s1, %s1335_s26  }
  0x13   :  { %s83_s24 = sshll.u32 %s1339_s23, 4  ;;  %s1340_s25 = smov 128   ;;  %s84_s24 = int_to_ptr.vmem [resolvable:$true] %s83_s24 }
  0x14   :  { %s1341_s2 = smov 8   ;;  %s111_s29 = sshll.u32 %s1493_s10, 4  ;;  %s112_s29 = int_to_ptr.hbm [resolvable:$true] %s111_s29 }
  0x15   :  { %89 = dma.hbm_to_vmem [thread:$0]  %s82_s0, 2048, %s84_s24, [#allocation9], %s1340_s25, %s1340_s25, %s1341_s2  }
  0x16   :  { %s1342_s6 = smov [#allocation13]   ;;  %s126_s15 = sshll.u32 %s1495_s12, 4  ;;  %s127_s15 = int_to_ptr.hbm [resolvable:$true] %s126_s15 }
  0x17   :  { %s113_s4 = sshll.u32 %s1342_s6, 4  ;;  %s1343_s16 = smov [#allocation14]   ;;  %s114_s4 = int_to_ptr.vmem [resolvable:$true] %s113_s4 }
  0x18   :  { %119 = dma.hbm_to_vmem [thread:$0]  %s112_s29, 1024, %s114_s4, [#allocation12], %s1334_s1, %s1334_s1, %s1335_s26  }
  0x19   :  { %s128_s17 = sshll.u32 %s1343_s16, 4  ;;  %s129_s17 = int_to_ptr.vmem [resolvable:$true] %s128_s17 }
  0x1a   :  { %134 = dma.hbm_to_vmem [thread:$0]  %s127_s15, 1024, %s129_s17, [#allocation15], %s1334_s1, %s1334_s1, %s1335_s26  }
  0x1b   :  { %1320 = dma.done.wait [#allocation3], 128  }
  0x1c   :  { %1321 = vsyncadd [#allocation3], 4294967168 }
  0x1d   :  { %1322 = dma.done.wait [#allocation6], 1152  }
  0x1e   :  { %1323 = vsyncadd [#allocation6], 4294966144 }
  0x1f   :  { %1324 = dma.done.wait [#allocation9], 3072  }
  0x20   :  { %1325 = vsyncadd [#allocation9], 4294964224 }
  0x21   :  { %1326 = dma.done.wait [#allocation12], 2048  }
  0x22   :  { %1327 = vsyncadd [#allocation12], 4294965248 }
  0x23   :  { %1328 = dma.done.wait [#allocation15], 1024  }
  0x24   :  { %1329 = vsyncadd [#allocation15], 4294966272  ;;  %v1024_v0 = vld [vmem:[#allocation7 + $0x38] sm:$0xff]  ;;  %v1023_v1 = vld [vmem:[#allocation7 + $0x30] sm:$0xff]  ;;  %s1346_s19 = smov 48   ;;  %vm763_vm3 = vcmask 130048  }
  0x25   :  { %239 = vmatpush.bf16.msra.mxu0 %v1024_v0  ;;  %v1032_v2 = vld [vmem:[#allocation8 + $0x38] sm:$0xff]  ;;  %v1022_v3 = vld [vmem:[#allocation7 + $0x28] sm:$0xff]  ;;  %v1031_v4 = vld [vmem:[#allocation8 + $0x30] sm:$0xff]  ;;  %vm765_vm4 = vcmask 261120   ;;  %vm767_vm5 = vcmask 392192   ;;  %s779_s2 = sshll.u32 %s1497_s14, 4  ;;  %s780_s2 = int_to_ptr.hbm [resolvable:$true] %s779_s2 }
  0x26   :  { %322 = vmatpush.bf16.msra.mxu1 %v1032_v2  ;;  %v1030_v5 = vld [vmem:[#allocation8 + $0x28] sm:$0xff]  ;;  %v1021_v6 = vld [vmem:[#allocation7 + $0x20] sm:$0xff]  ;;  %v1020_v8 = vld [vmem:[#allocation7 + $0x18] sm:$0xff]  ;;  %vm769_vm6 = vcmask 523264  }
  0x27   :  { %v1029_v7 = vld [vmem:[#allocation8 + $0x20] sm:$0xff]  ;;  %v1028_v9 = vld [vmem:[#allocation8 + $0x18] sm:$0xff]  ;;  %v1019_v10 = vld [vmem:[#allocation7 + $0x10] sm:$0xff] }
  0x28   :  { %v1027_v11 = vld [vmem:[#allocation8 + $0x10] sm:$0xff]  ;;  %v1018_v12 = vld [vmem:[#allocation7 + $0x8] sm:$0xff]  ;;  %v1017_v13 = vld [vmem:[#allocation7] sm:$0xff] }
  0x29   :  { %240 = vmatpush.bf16.msra.mxu0 %v1023_v1  ;;  %v169_v14 = vld [vmem:[#allocation2] sm:$0xff]  ;;  %v1026_v16 = vld [vmem:[#allocation8 + $0x8] sm:$0xff]  ;;  %v1025_v17 = vld [vmem:[#allocation8] sm:$0xff] }
  0x2a   :  { %323 = vmatpush.bf16.msra.mxu1 %v1031_v4  ;;  %v170_v15 = vpack.c.bf16 %v169_v14, %v169_v14  ;;  %v915_v18 = vld [vmem:[#allocation10 + $0x70] sm:$0xf]  ;;  %v1048_v19 = vld [vmem:[#allocation10 + $0x74] sm:$0xf0]  ;;  %v1047_v20 = vld [vmem:[#allocation10 + $0x74] sm:$0xf] }
  0x2b   :  { %v916_v21 = vor.u32 %v1048_v19, %v915_v18  ;;  %v917_v22 = vld [vmem:[#allocation10 + $0x78] sm:$0xf0]  ;;  %v907_v23 = vld [vmem:[#allocation10 + $0x60] sm:$0xf]  ;;  %v1046_v24 = vld [vmem:[#allocation10 + $0x64] sm:$0xf0] }
  0x2c   :  { %v920_v25 = vor.u32 %v1047_v20, %v917_v22  ;;  %v1045_v26 = vld [vmem:[#allocation10 + $0x64] sm:$0xf]  ;;  %v909_v27 = vld [vmem:[#allocation10 + $0x68] sm:$0xf0]  ;;  %v908_v28 = vor.u32 %v1046_v24, %v907_v23  ;;  %v899_v30 = vld [vmem:[#allocation10 + $0x50] sm:$0xf] }
  0x2d   :  { %241 = vmatpush.bf16.msra.mxu0 %v1022_v3  ;;  %439 = vmatpush.bf16.msra.mxu2 %v916_v21  ;;  %v912_v29 = vor.u32 %v1045_v26, %v909_v27  ;;  %v1044_v31 = vld [vmem:[#allocation10 + $0x54] sm:$0xf0]  ;;  %v1043_v32 = vld [vmem:[#allocation10 + $0x54] sm:$0xf]  ;;  %v901_v33 = vld [vmem:[#allocation10 + $0x58] sm:$0xf0] }
  0x2e   :  { %324 = vmatpush.bf16.msra.mxu1 %v1030_v5  ;;  %452 = vmatpush.bf16.msra.mxu3 %v920_v25  ;;  %v900_v34 = vor.u32 %v1044_v31, %v899_v30  ;;  %v904_v35 = vor.u32 %v1043_v32, %v901_v33  ;;  %v891_v36 = vld [vmem:[#allocation10 + $0x40] sm:$0xf]  ;;  %v1042_v37 = vld [vmem:[#allocation10 + $0x44] sm:$0xf0]  ;;  %v1041_v38 = vld [vmem:[#allocation10 + $0x44] sm:$0xf] }
  0x2f   :  { %v893_v39 = vld [vmem:[#allocation10 + $0x48] sm:$0xf0]  ;;  %v892_v40 = vor.u32 %v1042_v37, %v891_v36  ;;  %v883_v42 = vld [vmem:[#allocation10 + $0x30] sm:$0xf]  ;;  %v1040_v43 = vld [vmem:[#allocation10 + $0x34] sm:$0xf0] }
  0x30   :  { %v896_v41 = vor.u32 %v1041_v38, %v893_v39  ;;  %v1039_v44 = vld [vmem:[#allocation10 + $0x34] sm:$0xf]  ;;  %v885_v45 = vld [vmem:[#allocation10 + $0x38] sm:$0xf0]  ;;  %v884_v46 = vor.u32 %v1040_v43, %v883_v42  ;;  %v875_v48 = vld [vmem:[#allocation10 + $0x20] sm:$0xf] }
  0x31   :  { %242 = vmatpush.bf16.msra.mxu0 %v1021_v6  ;;  %440 = vmatpush.bf16.msra.mxu2 %v908_v28  ;;  %v888_v47 = vor.u32 %v1039_v44, %v885_v45  ;;  %v1038_v49 = vld [vmem:[#allocation10 + $0x24] sm:$0xf0]  ;;  %v1037_v50 = vld [vmem:[#allocation10 + $0x24] sm:$0xf]  ;;  %v877_v51 = vld [vmem:[#allocation10 + $0x28] sm:$0xf0] }
  0x32   :  { %325 = vmatpush.bf16.msra.mxu1 %v1029_v7  ;;  %453 = vmatpush.bf16.msra.mxu3 %v912_v29  ;;  %v876_v52 = vor.u32 %v1038_v49, %v875_v48  ;;  %v880_v53 = vor.u32 %v1037_v50, %v877_v51  ;;  %v1089_v54 = vld [vmem:[%s1486_s3] ss:$0 sm:$0xff]  ;;  %v1036_v61 = vld [vmem:[#allocation10 + $0x14] sm:$0xf0]  ;;  %v1035_v62 = vld [vmem:[#allocation10 + $0x14] sm:$0xf] }
  0x33   :  { %v867_v60 = vld [vmem:[#allocation10 + $0x10] sm:$0xf]  ;;  %v869_v0 = vld [vmem:[#allocation10 + $0x18] sm:$0xf0]  ;;  %v859_v2 = vld [vmem:[#allocation10] sm:$0xf] }
  0x34   :  { %v868_v63 = vor.u32 %v1036_v61, %v867_v60  ;;  %v872_v1 = vor.u32 %v1035_v62, %v869_v0  ;;  %v1034_v3 = vld [vmem:[#allocation10 + $0x4] sm:$0xf0]  ;;  %v1033_v4 = vld [vmem:[#allocation10 + $0x4] sm:$0xf]  ;;  %v861_v6 = vld [vmem:[#allocation10 + $0x8] sm:$0xf0] }
  0x35   :  { %243 = vmatpush.bf16.msra.mxu0 %v1020_v8  ;;  %441 = vmatpush.bf16.msra.mxu2 %v900_v34  ;;  %v860_v5 = vor.u32 %v1034_v3, %v859_v2  ;;  %v864_v7 = vor.u32 %v1033_v4, %v861_v6  ;;  %v1090_v8 = vld [vmem:[%s1488_s5] ss:$0 sm:$0xff]  ;;  %v1056_v14 = vld [vmem:[#allocation11 + $0x38] sm:$0xff]  ;;  %v1054_v21 = vld [vmem:[#allocation11 + $0x28] sm:$0xff]  ;;  %s1344_s5 = smov 16  }
  0x36   :  { %326 = vmatpush.bf16.msra.mxu1 %v1028_v9  ;;  %454 = vmatpush.bf16.msra.mxu3 %v904_v35  ;;  %v1055_v18 = vld [vmem:[#allocation11 + $0x30] sm:$0xff]  ;;  %v1053_v25 = vld [vmem:[#allocation11 + $0x20] sm:$0xff]  ;;  %v1052_v30 = vld [vmem:[#allocation11 + $0x18] sm:$0xff] }
  0x37   :  { %v1051_v31 = vld [vmem:[#allocation11 + $0x10] sm:$0xff]  ;;  %v1050_v34 = vld [vmem:[#allocation11 + $0x8] sm:$0xff]  ;;  %v1049_v36 = vld [vmem:[#allocation11] sm:$0xff] }
  0x38   :  { %v1064_v60 = vld [vmem:[#allocation13 + $0x38] sm:$0xff]  ;;  %v1063_v61 = vld [vmem:[#allocation13 + $0x30] sm:$0xff]  ;;  %v1062_v62 = vld [vmem:[#allocation13 + $0x28] sm:$0xff] }
  0x39   :  { %244 = vmatpush.bf16.msra.mxu0 %v1019_v10  ;;  %442 = vmatpush.bf16.msra.mxu2 %v892_v40  ;;  %v1060_v0 = vld [vmem:[#allocation13 + $0x18] sm:$0xff]  ;;  %v1058_v2 = vld [vmem:[#allocation13 + $0x8] sm:$0xff]  ;;  %v1057_v3 = vld [vmem:[#allocation13] sm:$0xff] }
  0x3a   :  { %327 = vmatpush.bf16.msra.mxu1 %v1027_v11  ;;  %455 = vmatpush.bf16.msra.mxu3 %v896_v41  ;;  %v1072_v4 = vld [vmem:[#allocation14 + $0x38] sm:$0xff]  ;;  %v1070_v6 = vld [vmem:[#allocation14 + $0x28] sm:$0xff] }
  0x3d   :  { %245 = vmatpush.bf16.msra.mxu0 %v1018_v12  ;;  %443 = vmatpush.bf16.msra.mxu2 %v884_v46 }
  0x3e   :  { %328 = vmatpush.bf16.msra.mxu1 %v1026_v16  ;;  %456 = vmatpush.bf16.msra.mxu3 %v888_v47 }
  0x41   :  { %246 = vmatpush.bf16.msra.mxu0 %v1017_v13  ;;  %444 = vmatpush.bf16.msra.mxu2 %v876_v52 }
  0x42   :  { %329 = vmatpush.bf16.msra.mxu1 %v1025_v17  ;;  %457 = vmatpush.bf16.msra.mxu3 %v880_v53  ;;  %v480_v53 = vld [vmem:[#allocation5] sm:$0xff] }
  0x44   :  { %247 = vmatmul.bf16.vlgmr.msra.gmra.mxu0 %v170_v15  ;;  %v353_v15 = vld [vmem:[%s1490_s7] sm:$0x3]  ;;  %s1345_s7 = smov 32  }
  0x45   :  { %445 = vmatpush.bf16.msra.mxu2 %v868_v63  ;;  %565 = vmatpush.bf16.msrb.mxu0 %v1056_v14  ;;  %v355_v16 = vperm.slane %v353_v15, 0  ;;  %v356_v17 = vperm.slane %v353_v15, 1  ;;  %v1061_v63 = vld [vmem:[#allocation13 + $0x20] sm:$0xff] }
  0x46   :  { %458 = vmatpush.bf16.msra.mxu3 %v872_v1  ;;  %648 = vmatpush.bf16.msrb.mxu1 %v1064_v60  ;;  %v1059_v1 = vld [vmem:[#allocation13 + $0x10] sm:$0xff] }
  0x49   :  { %446 = vmatpush.bf16.msra.mxu2 %v860_v5  ;;  %566 = vmatpush.bf16.msrb.mxu0 %v1055_v18  ;;  %v1071_v5 = vld [vmem:[#allocation14 + $0x30] sm:$0xff] }
  0x4a   :  { %459 = vmatpush.bf16.msra.mxu3 %v864_v7  ;;  %649 = vmatpush.bf16.msrb.mxu1 %v1063_v61  ;;  %v1069_v7 = vld [vmem:[#allocation14 + $0x20] sm:$0xff]  ;;  %v1092_v18 = vld [vmem:[%s1494_s11] ss:$0 sm:$0xff]  ;;  %s1347_s11 = smov [#allocation16]  }
  0x4b   :  { %s777_s24 = sshll.u32 %s1347_s11, 4  ;;  %s778_s24 = int_to_ptr.vmem [resolvable:$true] %s777_s24 }
  0x4d   :  { %567 = vmatpush.bf16.msrb.mxu0 %v1054_v21  ;;  %731 = vmatpush.bf16.msrb.mxu2 %v1072_v4 }
  0x4e   :  { %650 = vmatpush.bf16.msrb.mxu1 %v1062_v62 }
  0x51   :  { %568 = vmatpush.bf16.msrb.mxu0 %v1053_v25  ;;  %732 = vmatpush.bf16.msrb.mxu2 %v1071_v5 }
  0x52   :  { %651 = vmatpush.bf16.msrb.mxu1 %v1061_v63 }
  0x55   :  { %569 = vmatpush.bf16.msrb.mxu0 %v1052_v30  ;;  %733 = vmatpush.bf16.msrb.mxu2 %v1070_v6 }
  0x56   :  { %652 = vmatpush.bf16.msrb.mxu1 %v1060_v0 }
  0x59   :  { %570 = vmatpush.bf16.msrb.mxu0 %v1051_v31  ;;  %734 = vmatpush.bf16.msrb.mxu2 %v1069_v7 }
  0x5a   :  { %653 = vmatpush.bf16.msrb.mxu1 %v1059_v1 }
  0x5d   :  { %571 = vmatpush.bf16.msrb.mxu0 %v1050_v34 }
  0x5e   :  { %654 = vmatpush.bf16.msrb.mxu1 %v1058_v2 }
  0x61   :  { %572 = vmatpush.bf16.msrb.mxu0 %v1049_v36 }
  0x62   :  { %655 = vmatpush.bf16.msrb.mxu1 %v1057_v3 }
  0xc1   :  { %v248_v55 = vpop.f32.mrf.mxu0 }
  0xc2   :  { %v249_v56 = vadd.f32 %v1089_v54, %v248_v55 }
  0xc4   :  { %v252_v57 = vmax.f32 %v249_v56, 0.0 }
  0xc6   :  { %v253_v58 = vpack.c.bf16 %v252_v57, %v252_v57 }
  0xc8   :  { %330 = vmatmul.bf16.vlgmr.msra.gmra.mxu1 %v253_v58 }
  0xc9   :  { %v250_v59 = vpop.f32.mrf.mxu0 }
 0x145   :  { %v331_v9 = vpop.f32.mrf.mxu1 }
 0x146   :  { %v332_v10 = vadd.f32 %v1090_v8, %v331_v9  ;;  %v1068_v8 = vld [vmem:[#allocation14 + $0x18] sm:$0xff]  ;;  %v1067_v9 = vld [vmem:[#allocation14 + $0x10] sm:$0xff] }
 0x147   :  { %735 = vmatpush.bf16.msrb.mxu2 %v1068_v8 }
 0x148   :  { %v335_v11 = vmax.f32 %v332_v10, 0.0  ;;  %v1091_v10 = vld [vmem:[%s1492_s9] ss:$0 sm:$0xff] }
 0x14a   :  { %v336_v12 = vpack.c.bf16 %v335_v11, %v335_v11 }
 0x14b   :  { %736 = vmatpush.bf16.msrb.mxu2 %v1067_v9 }
 0x14c   :  { %447 = vmatmul.bf16.vlgmr.msra.gmra.mxu2 %v336_v12  ;;  %460 = vmatmul.bf16.vlgmr.msra.gmra.mxu3 %v336_v12 }
 0x14d   :  { %v333_v13 = vpop.f32.mrf.mxu1 }
 0x1cf   :  { %v448_v19 = vpop.f32.mrf.mxu2  ;;  %v461_v20 = vpop.f32.mrf.mxu3 }
 0x1d0   :  { %v449_v22 = vadd.f32 %v448_v19, %v355_v16  ;;  %v462_v23 = vadd.f32 %v461_v20, %v356_v17  ;;  %v1066_v16 = vld [vmem:[#allocation14 + $0x8] sm:$0xff]  ;;  %v1065_v17 = vld [vmem:[#allocation14] sm:$0xff] }
 0x1d1   :  { %737 = vmatpush.bf16.msrb.mxu2 %v1066_v16 }
 0x1d2   :  { %v466_v24 = vand.u32 2147483647, %v462_v23  ;;  %752 = vrot.lane.b32.xlu0 %v449_v22, %s1344_s5  ;;  %v465_v42 = vmax.f32 %v462_v23, 0.0 }
 0x1d4   :  { %v467_v26 = vsub.f32 0.0, %v466_v24  ;;  %v1093_v24 = vld [vmem:[%s1496_s13] ss:$0 sm:$0xff] }
 0x1d5   :  { %738 = vmatpush.bf16.msrb.mxu2 %v1065_v17 }
 0x1d6   :  { %v468_v27 = vmul.f32 1.442695, %v467_v26 }
 0x1d7   :  { %v450_v28 = vpop.f32.mrf.mxu2  ;;  %v463_v29 = vpop.f32.mrf.mxu3 }
 0x1d8   :  { %1094 = vpow2.f32 %v468_v27 }
 0x1de   :  { %v1095_v32 = vpop.eup %1094 }
 0x1df   :  { %v470_v33 = vadd.f32 1.0, %v1095_v32  ;;  %v473_v35 = vmul.f32 -0.5, %v1095_v32  ;;  %v476_v38 = vand.u32 2147483647, %v1095_v32 }
 0x1e1   :  { %1096 = vlog2.f32 %v470_v33  ;;  %v474_v37 = vadd.f32 1.0, %v473_v35  ;;  %vm477_vm0 = vcmp.lt.f32.partialorder %v476_v38, 0.0004427343 }
 0x1e3   :  { %v475_v41 = vmul.f32 %v1095_v32, %v474_v37 }
 0x1e7   :  { %v1097_v39 = vpop.eup %1096 }
 0x1e8   :  { %v472_v40 = vmul.f32 0.6931472, %v1097_v39 }
 0x1ea   :  { %v478_v43 = vsel %vm477_vm0, %v475_v41, %v472_v40 }
 0x1eb   :  { %v479_v44 = vadd.f32 %v478_v43, %v465_v42 }
 0x1ed   :  { %v481_v45 = vadd.f32 1e-10, %v479_v44  ;;  %756 = vrot.lane.b32.xlu0 %v479_v44, %s1345_s7 }
 0x1ef   :  { %1098 = vrsqrt.f32 %v481_v45  ;;  %vm489_vm1 = vcmp.eq.f32.partialorder %v481_v45, inf  ;;  %v492_v54 = vand.u32 2147483648, %v481_v45  ;;  %vm491_vm2 = vcmp.eq.f32.partialorder %v481_v45, 0.0 }
 0x1f5   :  { %v1099_v46 = vpop.eup %1098 }
 0x1f6   :  { %v483_v47 = vmul.f32 %v1099_v46, %v481_v45 }
 0x1f8   :  { %v484_v48 = vmul.f32 %v1099_v46, %v483_v47 }
 0x1fa   :  { %v485_v49 = vmul.f32 0.5, %v484_v48 }
 0x1fc   :  { %v486_v50 = vsub.f32 1.5, %v485_v49 }
 0x1fe   :  { %v487_v51 = vmul.f32 %v1099_v46, %v486_v50 }
 0x200   :  { %v488_v52 = vmul.f32 %v487_v51, %v481_v45 }
 0x202   :  { %v490_v55 = vsel %vm489_vm1, %v481_v45, %v488_v52 }
 0x203   :  { %v493_v56 = vsel %vm491_vm2, %v492_v54, %v490_v55 }
 0x204   :  { %v494_v57 = vmul.f32 %v493_v56, %v480_v53 }
 0x206   :  { %v495_v58 = vadd.f32 %v494_v57, %v449_v22 }
 0x208   :  { %760 = vrot.lane.b32.xlu1 %v495_v58, %s1346_s19  ;;  %v496_v59 = vpack.c.bf16 %v495_v58, %v495_v58 }
 0x20a   :  { %573 = vmatmul.bf16.vlgmr.msrb.gmra.mxu0 %v496_v59 }
 0x244   :  { %v753_v32 = vpop.permute.xlu0 %752 }
 0x25f   :  { %v757_v36 = vpop.permute.xlu0 %756 }
 0x27a   :  { %v761_v38 = vpop.permute.xlu1 %760 }
 0x287   :  { %v574_v11 = vpop.f32.mrf.mxu0 }
 0x288   :  { %v575_v12 = vadd.f32 %v1091_v10, %v574_v11 }
 0x28a   :  { %v578_v13 = vmax.f32 %v575_v12, 0.0 }
 0x28c   :  { %v579_v14 = vpack.c.bf16 %v578_v13, %v578_v13 }
 0x28e   :  { %656 = vmatmul.bf16.vlgmr.msrb.gmra.mxu1 %v579_v14 }
 0x28f   :  { %v576_v15 = vpop.f32.mrf.mxu0 }
 0x30b   :  { %v657_v19 = vpop.f32.mrf.mxu1 }
 0x30c   :  { %v658_v20 = vadd.f32 %v1092_v18, %v657_v19 }
 0x30e   :  { %v661_v21 = vmax.f32 %v658_v20, 0.0 }
 0x310   :  { %v662_v22 = vpack.c.bf16 %v661_v21, %v661_v21 }
 0x312   :  { %739 = vmatmul.bf16.vlgmr.msrb.gmra.mxu2 %v662_v22 }
 0x313   :  { %v659_v23 = vpop.f32.mrf.mxu1 }
 0x395   :  { %v740_v25 = vpop.f32.mrf.mxu2 }
 0x396   :  { %v741_v26 = vadd.f32 %v1093_v24, %v740_v25 }
 0x398   :  { %v744_v27 = vsub.f32 0.0, %v741_v26 }
 0x39a   :  { %v745_v28 = vmul.f32 1.442695, %v744_v27 }
 0x39c   :  { %1100 = vpow2.f32 %v745_v28 }
 0x39d   :  { %v742_v29 = vpop.f32.mrf.mxu2 }
 0x3a2   :  { %v1101_v30 = vpop.eup %1100 }
 0x3a3   :  { %v747_v31 = vadd.f32 1.0, %v1101_v30 }
 0x3a5   :  { %1102 = vrcp.f32 %v747_v31 }
 0x3ab   :  { %v1103_v33 = vpop.eup %1102 }
 0x3ac   :  { %v749_v34 = vmax.f32 %v1103_v33, 0.0 }
 0x3ae   :  { %v750_v35 = vmin.f32 %v749_v34, 1.0 }
 0x3b0   :  { %v764_v37 = vsel %vm763_vm3, %v750_v35, %v753_v32 }
 0x3b1   :  { %v766_v39 = vsel %vm765_vm4, %v764_v37, %v757_v36 }
 0x3b2   :  { %v768_v40 = vsel %vm767_vm5, %v766_v39, %v761_v38 }
 0x3b3   :  { %v770_v41 = vsel %vm769_vm6, %v768_v40, 0.0 }
 0x3b4   :  { %771 = vst [vmem:[#allocation16] sm:$0xff] %v770_v41 }
 0x3b5   :  { %782 = dma.vmem_to_hbm [thread:$0]  %s778_s24, 128, %s780_s2, [#allocation4]  }
 0x3b6   :  { %1330 = dma.done.wait [#allocation4], 128  }
 0x3b7   :  { %1331 = vsyncadd [#allocation4], 4294967168 }
 0x3b8   :  { %787 = vsyncpa [#allocation3], 1 }
 0x3b9   :  { %788 = vsyncpa [#allocation6], 1 }
 0x3ba   :  { %789 = vsyncpa [#allocation9], 1 }
 0x3bb   :  { %790 = vsyncpa [#allocation12], 1 }
 0x3bc   :  { %791 = vsyncpa [#allocation15], 1 }
 0x3bd   :  { %792 = vsyncpa [#allocation4], 1 }

// kernel: tpu_custom_call.1
= control target key start
LH: loop header
LB: loop body
LE: loop exit
PB: predicated region body
PF: predicated region fallthrough
CT: control target
= control target key end

     0   :  { %19 = vsyncpa [#allocation3], 0  ;;  %s1483_s0 = inlined_call_operand.hbm [shape: f32[8,128], index: 0, kind: input, shape index: {}]   ;;  %s1484_s1 = inlined_call_operand.hbm [shape: f32[8,128], index: 1, kind: input, shape index: {}]   ;;  %s1485_s2 = inlined_call_operand.hbm [shape: bf16[128,128], index: 2, kind: input, shape index: {}]   ;;  %s1486_s3 = inlined_call_operand.vmem [shape: f32[1,128], index: 3, kind: input, shape index: {}]   ;;  %s1487_s4 = inlined_call_operand.hbm [shape: bf16[128,128], index: 4, kind: input, shape index: {}]   ;;  %s1488_s5 = inlined_call_operand.vmem [shape: f32[1,128], index: 5, kind: input, shape index: {}]   ;;  %s1489_s6 = inlined_call_operand.hbm [shape: bf16[128,256], index: 6, kind: input, shape index: {}]   ;;  %s1490_s7 = inlined_call_operand.vmem [shape: f32[1,256], index: 7, kind: input, shape index: {}]   ;;  %s1491_s8 = inlined_call_operand.hbm [shape: bf16[128,128], index: 8, kind: input, shape index: {}]   ;;  %s1492_s9 = inlined_call_operand.vmem [shape: f32[1,128], index: 9, kind: input, shape index: {}]   ;;  %s1493_s10 = inlined_call_operand.hbm [shape: bf16[128,128], index: 10, kind: input, shape index: {}]   ;;  %s1494_s11 = inlined_call_operand.vmem [shape: f32[1,128], index: 11, kind: input, shape index: {}]   ;;  %s1495_s12 = inlined_call_operand.hbm [shape: bf16[128,128], index: 12, kind: input, shape index: {}]   ;;  %s1496_s13 = inlined_call_operand.vmem [shape: f32[1,128], index: 13, kind: input, shape index: {}]   ;;  %s1497_s14 = inlined_call_operand.hbm [shape: f32[8,128], index: 14, kind: output, shape index: {}]  }
   0x1   :  { %20 = vsyncpa [#allocation6], 0 }
   0x2   :  { %21 = vsyncpa [#allocation9], 0 }
   0x3   :  { %22 = vsyncpa [#allocation12], 0 }
   0x4   :  { %23 = vsyncpa [#allocation15], 0  ;;  %s41_s15 = sshll.u32 %s1484_s1, 4  ;;  %s42_s15 = int_to_ptr.hbm [resolvable:$true] %s41_s15 }
   0x5   :  { %24 = vsyncpa [#allocation4], 0  ;;  %s1332_s16 = smov [#allocation5]   ;;  %s66_s20 = sshll.u32 %s1487_s4, 4  ;;  %s67_s20 = int_to_ptr.hbm [resolvable:$true] %s66_s20 }
   0x6   :  { %s43_s17 = sshll.u32 %s1332_s16, 4  ;;  %s1333_s21 = smov [#allocation8]   ;;  %s44_s17 = int_to_ptr.vmem [resolvable:$true] %s43_s17 }
   0x7   :  { %46 = dma.hbm_to_vmem [thread:$0]  %s42_s15, 128, %s44_s17, [#allocation6]  }
   0x8   :  { %s68_s22 = sshll.u32 %s1333_s21, 4  ;;  %s96_s25 = sshll.u32 %s1491_s8, 4  ;;  %s69_s22 = int_to_ptr.vmem [resolvable:$true] %s68_s22  ;;  %s97_s25 = int_to_ptr.hbm [resolvable:$true] %s96_s25 }
   0x9   :  { %s1334_s1 = smov 64   ;;  %s1335_s26 = smov 4  }
   0xa   :  { %74 = dma.hbm_to_vmem [thread:$0]  %s67_s20, 1024, %s69_s22, [#allocation9], %s1334_s1, %s1334_s1, %s1335_s26  }
   0xb   :  { %s30_s29 = sshll.u32 %s1483_s0, 4  ;;  %s1336_s4 = smov [#allocation11]   ;;  %s31_s29 = int_to_ptr.hbm [resolvable:$true] %s30_s29 }
   0xc   :  { %s98_s30 = sshll.u32 %s1336_s4, 4  ;;  %s1337_s8 = smov [#allocation2]   ;;  %s99_s30 = int_to_ptr.vmem [resolvable:$true] %s98_s30 }
   0xd   :  { %104 = dma.hbm_to_vmem [thread:$0]  %s97_s25, 1024, %s99_s30, [#allocation12], %s1334_s1, %s1334_s1, %s1335_s26  }
   0xe   :  { %s32_s15 = sshll.u32 %s1337_s8, 4  ;;  %s51_s18 = sshll.u32 %s1485_s2, 4  ;;  %s33_s15 = int_to_ptr.vmem [resolvable:$true] %s32_s15  ;;  %s52_s18 = int_to_ptr.hbm [resolvable:$true] %s51_s18 }
   0xf   :  { %35 = dma.hbm_to_vmem [thread:$0]  %s31_s29, 128, %s33_s15, [#allocation3]  }
  0x10   :  { %s81_s0 = sshll.u32 %s1489_s6, 4  ;;  %s1338_s21 = smov [#allocation7]   ;;  %s82_s0 = int_to_ptr.hbm [resolvable:$true] %s81_s0 }
  0x11   :  { %s53_s22 = sshll.u32 %s1338_s21, 4  ;;  %s1339_s23 = smov [#allocation10]   ;;  %s54_s22 = int_to_ptr.vmem [resolvable:$true] %s53_s22 }
  0x12   :  { %59 = dma.hbm_to_vmem [thread:$0]  %s52_s18, 1024, %s54_s22, [#allocation6], %s1334_s1, %s1334_s1, %s1335_s26  }
  0x13   :  { %s83_s24 = sshll.u32 %s1339_s23, 4  ;;  %s1340_s25 = smov 128   ;;  %s84_s24 = int_to_ptr.vmem [resolvable:$true] %s83_s24 }
  0x14   :  { %s1341_s2 = smov 8   ;;  %s111_s29 = sshll.u32 %s1493_s10, 4  ;;  %s112_s29 = int_to_ptr.hbm [resolvable:$true] %s111_s29 }
  0x15   :  { %89 = dma.hbm_to_vmem [thread:$0]  %s82_s0, 2048, %s84_s24, [#allocation9], %s1340_s25, %s1340_s25, %s1341_s2  }
  0x16   :  { %s1342_s6 = smov [#allocation13]   ;;  %s126_s15 = sshll.u32 %s1495_s12, 4  ;;  %s127_s15 = int_to_ptr.hbm [resolvable:$true] %s126_s15 }
  0x17   :  { %s113_s4 = sshll.u32 %s1342_s6, 4  ;;  %s1343_s16 = smov [#allocation14]   ;;  %s114_s4 = int_to_ptr.vmem [resolvable:$true] %s113_s4 }
  0x18   :  { %119 = dma.hbm_to_vmem [thread:$0]  %s112_s29, 1024, %s114_s4, [#allocation12], %s1334_s1, %s1334_s1, %s1335_s26  }
  0x19   :  { %s128_s17 = sshll.u32 %s1343_s16, 4  ;;  %s129_s17 = int_to_ptr.vmem [resolvable:$true] %s128_s17 }
  0x1a   :  { %134 = dma.hbm_to_vmem [thread:$0]  %s127_s15, 1024, %s129_s17, [#allocation15], %s1334_s1, %s1334_s1, %s1335_s26  }
  0x1b   :  { %1320 = dma.done.wait [#allocation3], 128  }
  0x1c   :  { %1321 = vsyncadd [#allocation3], 4294967168 }
  0x1d   :  { %1322 = dma.done.wait [#allocation6], 1152  }
  0x1e   :  { %1323 = vsyncadd [#allocation6], 4294966144 }
  0x1f   :  { %1324 = dma.done.wait [#allocation9], 3072  }
  0x20   :  { %1325 = vsyncadd [#allocation9], 4294964224 }
  0x21   :  { %1326 = dma.done.wait [#allocation12], 2048  }
  0x22   :  { %1327 = vsyncadd [#allocation12], 4294965248 }
  0x23   :  { %1328 = dma.done.wait [#allocation15], 1024  }
  0x24   :  { %1329 = vsyncadd [#allocation15], 4294966272  ;;  %v1024_v0 = vld [vmem:[#allocation7 + $0x38] sm:$0xff]  ;;  %v1023_v1 = vld [vmem:[#allocation7 + $0x30] sm:$0xff]  ;;  %s1346_s19 = smov 48   ;;  %vm763_vm3 = vcmask 130048  }
  0x25   :  { %239 = vmatpush.bf16.msra.mxu0 %v1024_v0  ;;  %v1032_v2 = vld [vmem:[#allocation8 + $0x38] sm:$0xff]  ;;  %v1022_v3 = vld [vmem:[#allocation7 + $0x28] sm:$0xff]  ;;  %v1031_v4 = vld [vmem:[#allocation8 + $0x30] sm:$0xff]  ;;  %vm765_vm4 = vcmask 261120   ;;  %vm767_vm5 = vcmask 392192   ;;  %s779_s2 = sshll.u32 %s1497_s14, 4  ;;  %s780_s2 = int_to_ptr.hbm [resolvable:$true] %s779_s2 }
  0x26   :  { %322 = vmatpush.bf16.msra.mxu1 %v1032_v2  ;;  %v1030_v5 = vld [vmem:[#allocation8 + $0x28] sm:$0xff]  ;;  %v1021_v6 = vld [vmem:[#allocation7 + $0x20] sm:$0xff]  ;;  %v1020_v8 = vld [vmem:[#allocation7 + $0x18] sm:$0xff]  ;;  %vm769_vm6 = vcmask 523264  }
  0x27   :  { %v1029_v7 = vld [vmem:[#allocation8 + $0x20] sm:$0xff]  ;;  %v1028_v9 = vld [vmem:[#allocation8 + $0x18] sm:$0xff]  ;;  %v1019_v10 = vld [vmem:[#allocation7 + $0x10] sm:$0xff] }
  0x28   :  { %v1027_v11 = vld [vmem:[#allocation8 + $0x10] sm:$0xff]  ;;  %v1018_v12 = vld [vmem:[#allocation7 + $0x8] sm:$0xff]  ;;  %v1017_v13 = vld [vmem:[#allocation7] sm:$0xff] }
  0x29   :  { %240 = vmatpush.bf16.msra.mxu0 %v1023_v1  ;;  %v169_v14 = vld [vmem:[#allocation2] sm:$0xff]  ;;  %v1026_v16 = vld [vmem:[#allocation8 + $0x8] sm:$0xff]  ;;  %v1025_v17 = vld [vmem:[#allocation8] sm:$0xff] }
  0x2a   :  { %323 = vmatpush.bf16.msra.mxu1 %v1031_v4  ;;  %v170_v15 = vpack.c.bf16 %v169_v14, %v169_v14  ;;  %v915_v18 = vld [vmem:[#allocation10 + $0x70] sm:$0xf]  ;;  %v1048_v19 = vld [vmem:[#allocation10 + $0x74] sm:$0xf0]  ;;  %v1047_v20 = vld [vmem:[#allocation10 + $0x74] sm:$0xf] }
  0x2b   :  { %v916_v21 = vor.u32 %v1048_v19, %v915_v18  ;;  %v917_v22 = vld [vmem:[#allocation10 + $0x78] sm:$0xf0]  ;;  %v907_v23 = vld [vmem:[#allocation10 + $0x60] sm:$0xf]  ;;  %v1046_v24 = vld [vmem:[#allocation10 + $0x64] sm:$0xf0] }
  0x2c   :  { %v920_v25 = vor.u32 %v1047_v20, %v917_v22  ;;  %v1045_v26 = vld [vmem:[#allocation10 + $0x64] sm:$0xf]  ;;  %v909_v27 = vld [vmem:[#allocation10 + $0x68] sm:$0xf0]  ;;  %v908_v28 = vor.u32 %v1046_v24, %v907_v23  ;;  %v899_v30 = vld [vmem:[#allocation10 + $0x50] sm:$0xf] }
  0x2d   :  { %241 = vmatpush.bf16.msra.mxu0 %v1022_v3  ;;  %439 = vmatpush.bf16.msra.mxu2 %v916_v21  ;;  %v912_v29 = vor.u32 %v1045_v26, %v909_v27  ;;  %v1044_v31 = vld [vmem:[#allocation10 + $0x54] sm:$0xf0]  ;;  %v1043_v32 = vld [vmem:[#allocation10 + $0x54] sm:$0xf]  ;;  %v901_v33 = vld [vmem:[#allocation10 + $0x58] sm:$0xf0] }
  0x2e   :  { %324 = vmatpush.bf16.msra.mxu1 %v1030_v5  ;;  %452 = vmatpush.bf16.msra.mxu3 %v920_v25  ;;  %v900_v34 = vor.u32 %v1044_v31, %v899_v30  ;;  %v904_v35 = vor.u32 %v1043_v32, %v901_v33  ;;  %v891_v36 = vld [vmem:[#allocation10 + $0x40] sm:$0xf]  ;;  %v1042_v37 = vld [vmem:[#allocation10 + $0x44] sm:$0xf0]  ;;  %v1041_v38 = vld [vmem:[#allocation10 + $0x44] sm:$0xf] }
  0x2f   :  { %v893_v39 = vld [vmem:[#allocation10 + $0x48] sm:$0xf0]  ;;  %v892_v40 = vor.u32 %v1042_v37, %v891_v36  ;;  %v883_v42 = vld [vmem:[#allocation10 + $0x30] sm:$0xf]  ;;  %v1040_v43 = vld [vmem:[#allocation10 + $0x34] sm:$0xf0] }
  0x30   :  { %v896_v41 = vor.u32 %v1041_v38, %v893_v39  ;;  %v1039_v44 = vld [vmem:[#allocation10 + $0x34] sm:$0xf]  ;;  %v885_v45 = vld [vmem:[#allocation10 + $0x38] sm:$0xf0]  ;;  %v884_v46 = vor.u32 %v1040_v43, %v883_v42  ;;  %v875_v48 = vld [vmem:[#allocation10 + $0x20] sm:$0xf] }
  0x31   :  { %242 = vmatpush.bf16.msra.mxu0 %v1021_v6  ;;  %440 = vmatpush.bf16.msra.mxu2 %v908_v28  ;;  %v888_v47 = vor.u32 %v1039_v44, %v885_v45  ;;  %v1038_v49 = vld [vmem:[#allocation10 + $0x24] sm:$0xf0]  ;;  %v1037_v50 = vld [vmem:[#allocation10 + $0x24] sm:$0xf]  ;;  %v877_v51 = vld [vmem:[#allocation10 + $0x28] sm:$0xf0] }
  0x32   :  { %325 = vmatpush.bf16.msra.mxu1 %v1029_v7  ;;  %453 = vmatpush.bf16.msra.mxu3 %v912_v29  ;;  %v876_v52 = vor.u32 %v1038_v49, %v875_v48  ;;  %v880_v53 = vor.u32 %v1037_v50, %v877_v51  ;;  %v1089_v54 = vld [vmem:[%s1486_s3] ss:$0 sm:$0xff]  ;;  %v1036_v61 = vld [vmem:[#allocation10 + $0x14] sm:$0xf0]  ;;  %v1035_v62 = vld [vmem:[#allocation10 + $0x14] sm:$0xf] }
  0x33   :  { %v867_v60 = vld [vmem:[#allocation10 + $0x10] sm:$0xf]  ;;  %v869_v0 = vld [vmem:[#allocation10 + $0x18] sm:$0xf0]  ;;  %v859_v2 = vld [vmem:[#allocation10] sm:$0xf] }
  0x34   :  { %v868_v63 = vor.u32 %v1036_v61, %v867_v60  ;;  %v872_v1 = vor.u32 %v1035_v62, %v869_v0  ;;  %v1034_v3 = vld [vmem:[#allocation10 + $0x4] sm:$0xf0]  ;;  %v1033_v4 = vld [vmem:[#allocation10 + $0x4] sm:$0xf]  ;;  %v861_v6 = vld [vmem:[#allocation10 + $0x8] sm:$0xf0] }
  0x35   :  { %243 = vmatpush.bf16.msra.mxu0 %v1020_v8  ;;  %441 = vmatpush.bf16.msra.mxu2 %v900_v34  ;;  %v860_v5 = vor.u32 %v1034_v3, %v859_v2  ;;  %v864_v7 = vor.u32 %v1033_v4, %v861_v6  ;;  %v1090_v8 = vld [vmem:[%s1488_s5] ss:$0 sm:$0xff]  ;;  %v1056_v14 = vld [vmem:[#allocation11 + $0x38] sm:$0xff]  ;;  %v1054_v21 = vld [vmem:[#allocation11 + $0x28] sm:$0xff]  ;;  %s1344_s5 = smov 16  }
  0x36   :  { %326 = vmatpush.bf16.msra.mxu1 %v1028_v9  ;;  %454 = vmatpush.bf16.msra.mxu3 %v904_v35  ;;  %v1055_v18 = vld [vmem:[#allocation11 + $0x30] sm:$0xff]  ;;  %v1053_v25 = vld [vmem:[#allocation11 + $0x20] sm:$0xff]  ;;  %v1052_v30 = vld [vmem:[#allocation11 + $0x18] sm:$0xff] }
  0x37   :  { %v1051_v31 = vld [vmem:[#allocation11 + $0x10] sm:$0xff]  ;;  %v1050_v34 = vld [vmem:[#allocation11 + $0x8] sm:$0xff]  ;;  %v1049_v36 = vld [vmem:[#allocation11] sm:$0xff] }
  0x38   :  { %v1064_v60 = vld [vmem:[#allocation13 + $0x38] sm:$0xff]  ;;  %v1063_v61 = vld [vmem:[#allocation13 + $0x30] sm:$0xff]  ;;  %v1062_v62 = vld [vmem:[#allocation13 + $0x28] sm:$0xff] }
  0x39   :  { %244 = vmatpush.bf16.msra.mxu0 %v1019_v10  ;;  %442 = vmatpush.bf16.msra.mxu2 %v892_v40  ;;  %v1060_v0 = vld [vmem:[#allocation13 + $0x18] sm:$0xff]  ;;  %v1058_v2 = vld [vmem:[#allocation13 + $0x8] sm:$0xff]  ;;  %v1057_v3 = vld [vmem:[#allocation13] sm:$0xff] }
  0x3a   :  { %327 = vmatpush.bf16.msra.mxu1 %v1027_v11  ;;  %455 = vmatpush.bf16.msra.mxu3 %v896_v41  ;;  %v1072_v4 = vld [vmem:[#allocation14 + $0x38] sm:$0xff]  ;;  %v1070_v6 = vld [vmem:[#allocation14 + $0x28] sm:$0xff] }
  0x3d   :  { %245 = vmatpush.bf16.msra.mxu0 %v1018_v12  ;;  %443 = vmatpush.bf16.msra.mxu2 %v884_v46 }
  0x3e   :  { %328 = vmatpush.bf16.msra.mxu1 %v1026_v16  ;;  %456 = vmatpush.bf16.msra.mxu3 %v888_v47 }
  0x41   :  { %246 = vmatpush.bf16.msra.mxu0 %v1017_v13  ;;  %444 = vmatpush.bf16.msra.mxu2 %v876_v52 }
  0x42   :  { %329 = vmatpush.bf16.msra.mxu1 %v1025_v17  ;;  %457 = vmatpush.bf16.msra.mxu3 %v880_v53  ;;  %v480_v53 = vld [vmem:[#allocation5] sm:$0xff] }
  0x44   :  { %247 = vmatmul.bf16.vlgmr.msra.gmra.mxu0 %v170_v15  ;;  %v353_v15 = vld [vmem:[%s1490_s7] sm:$0x3]  ;;  %s1345_s7 = smov 32  }
  0x45   :  { %445 = vmatpush.bf16.msra.mxu2 %v868_v63  ;;  %565 = vmatpush.bf16.msrb.mxu0 %v1056_v14  ;;  %v355_v16 = vperm.slane %v353_v15, 0  ;;  %v356_v17 = vperm.slane %v353_v15, 1  ;;  %v1061_v63 = vld [vmem:[#allocation13 + $0x20] sm:$0xff] }
  0x46   :  { %458 = vmatpush.bf16.msra.mxu3 %v872_v1  ;;  %648 = vmatpush.bf16.msrb.mxu1 %v1064_v60  ;;  %v1059_v1 = vld [vmem:[#allocation13 + $0x10] sm:$0xff] }
  0x49   :  { %446 = vmatpush.bf16.msra.mxu2 %v860_v5  ;;  %566 = vmatpush.bf16.msrb.mxu0 %v1055_v18  ;;  %v1071_v5 = vld [vmem:[#allocation14 + $0x30] sm:$0xff] }
  0x4a   :  { %459 = vmatpush.bf16.msra.mxu3 %v864_v7  ;;  %649 = vmatpush.bf16.msrb.mxu1 %v1063_v61  ;;  %v1069_v7 = vld [vmem:[#allocation14 + $0x20] sm:$0xff]  ;;  %v1092_v18 = vld [vmem:[%s1494_s11] ss:$0 sm:$0xff]  ;;  %s1347_s11 = smov [#allocation16]  }
  0x4b   :  { %s777_s24 = sshll.u32 %s1347_s11, 4  ;;  %s778_s24 = int_to_ptr.vmem [resolvable:$true] %s777_s24 }
  0x4d   :  { %567 = vmatpush.bf16.msrb.mxu0 %v1054_v21  ;;  %731 = vmatpush.bf16.msrb.mxu2 %v1072_v4 }
  0x4e   :  { %650 = vmatpush.bf16.msrb.mxu1 %v1062_v62 }
  0x51   :  { %568 = vmatpush.bf16.msrb.mxu0 %v1053_v25  ;;  %732 = vmatpush.bf16.msrb.mxu2 %v1071_v5 }
  0x52   :  { %651 = vmatpush.bf16.msrb.mxu1 %v1061_v63 }
  0x55   :  { %569 = vmatpush.bf16.msrb.mxu0 %v1052_v30  ;;  %733 = vmatpush.bf16.msrb.mxu2 %v1070_v6 }
  0x56   :  { %652 = vmatpush.bf16.msrb.mxu1 %v1060_v0 }
  0x59   :  { %570 = vmatpush.bf16.msrb.mxu0 %v1051_v31  ;;  %734 = vmatpush.bf16.msrb.mxu2 %v1069_v7 }
  0x5a   :  { %653 = vmatpush.bf16.msrb.mxu1 %v1059_v1 }
  0x5d   :  { %571 = vmatpush.bf16.msrb.mxu0 %v1050_v34 }
  0x5e   :  { %654 = vmatpush.bf16.msrb.mxu1 %v1058_v2 }
  0x61   :  { %572 = vmatpush.bf16.msrb.mxu0 %v1049_v36 }
  0x62   :  { %655 = vmatpush.bf16.msrb.mxu1 %v1057_v3 }
  0xc1   :  { %v248_v55 = vpop.f32.mrf.mxu0 }
  0xc2   :  { %v249_v56 = vadd.f32 %v1089_v54, %v248_v55 }
  0xc4   :  { %v252_v57 = vmax.f32 %v249_v56, 0.0 }
  0xc6   :  { %v253_v58 = vpack.c.bf16 %v252_v57, %v252_v57 }
  0xc8   :  { %330 = vmatmul.bf16.vlgmr.msra.gmra.mxu1 %v253_v58 }
  0xc9   :  { %v250_v59 = vpop.f32.mrf.mxu0 }
 0x145   :  { %v331_v9 = vpop.f32.mrf.mxu1 }
 0x146   :  { %v332_v10 = vadd.f32 %v1090_v8, %v331_v9  ;;  %v1068_v8 = vld [vmem:[#allocation14 + $0x18] sm:$0xff]  ;;  %v1067_v9 = vld [vmem:[#allocation14 + $0x10] sm:$0xff] }
 0x147   :  { %735 = vmatpush.bf16.msrb.mxu2 %v1068_v8 }
 0x148   :  { %v335_v11 = vmax.f32 %v332_v10, 0.0  ;;  %v1091_v10 = vld [vmem:[%s1492_s9] ss:$0 sm:$0xff] }
 0x14a   :  { %v336_v12 = vpack.c.bf16 %v335_v11, %v335_v11 }
 0x14b   :  { %736 = vmatpush.bf16.msrb.mxu2 %v1067_v9 }
 0x14c   :  { %447 = vmatmul.bf16.vlgmr.msra.gmra.mxu2 %v336_v12  ;;  %460 = vmatmul.bf16.vlgmr.msra.gmra.mxu3 %v336_v12 }
 0x14d   :  { %v333_v13 = vpop.f32.mrf.mxu1 }
 0x1cf   :  { %v448_v19 = vpop.f32.mrf.mxu2  ;;  %v461_v20 = vpop.f32.mrf.mxu3 }
 0x1d0   :  { %v449_v22 = vadd.f32 %v448_v19, %v355_v16  ;;  %v462_v23 = vadd.f32 %v461_v20, %v356_v17  ;;  %v1066_v16 = vld [vmem:[#allocation14 + $0x8] sm:$0xff]  ;;  %v1065_v17 = vld [vmem:[#allocation14] sm:$0xff] }
 0x1d1   :  { %737 = vmatpush.bf16.msrb.mxu2 %v1066_v16 }
 0x1d2   :  { %v466_v24 = vand.u32 2147483647, %v462_v23  ;;  %752 = vrot.lane.b32.xlu0 %v449_v22, %s1344_s5  ;;  %v465_v42 = vmax.f32 %v462_v23, 0.0 }
 0x1d4   :  { %v467_v26 = vsub.f32 0.0, %v466_v24  ;;  %v1093_v24 = vld [vmem:[%s1496_s13] ss:$0 sm:$0xff] }
 0x1d5   :  { %738 = vmatpush.bf16.msrb.mxu2 %v1065_v17 }
 0x1d6   :  { %v468_v27 = vmul.f32 1.442695, %v467_v26 }
 0x1d7   :  { %v450_v28 = vpop.f32.mrf.mxu2  ;;  %v463_v29 = vpop.f32.mrf.mxu3 }
 0x1d8   :  { %1094 = vpow2.f32 %v468_v27 }
 0x1de   :  { %v1095_v32 = vpop.eup %1094 }
 0x1df   :  { %v470_v33 = vadd.f32 1.0, %v1095_v32  ;;  %v473_v35 = vmul.f32 -0.5, %v1095_v32  ;;  %v476_v38 = vand.u32 2147483647, %v1095_v32 }
 0x1e1   :  { %1096 = vlog2.f32 %v470_v33  ;;  %v474_v37 = vadd.f32 1.0, %v473_v35  ;;  %vm477_vm0 = vcmp.lt.f32.partialorder %v476_v38, 0.0004427343 }
 0x1e3   :  { %v475_v41 = vmul.f32 %v1095_v32, %v474_v37 }
 0x1e7   :  { %v1097_v39 = vpop.eup %1096 }
 0x1e8   :  { %v472_v40 = vmul.f32 0.6931472, %v1097_v39 }
 0x1ea   :  { %v478_v43 = vsel %vm477_vm0, %v475_v41, %v472_v40 }
 0x1eb   :  { %v479_v44 = vadd.f32 %v478_v43, %v465_v42 }
 0x1ed   :  { %v481_v45 = vadd.f32 1e-10, %v479_v44  ;;  %756 = vrot.lane.b32.xlu0 %v479_v44, %s1345_s7 }
 0x1ef   :  { %1098 = vrsqrt.f32 %v481_v45  ;;  %vm489_vm1 = vcmp.eq.f32.partialorder %v481_v45, inf  ;;  %v492_v54 = vand.u32 2147483648, %v481_v45  ;;  %vm491_vm2 = vcmp.eq.f32.partialorder %v481_v45, 0.0 }
 0x1f5   :  { %v1099_v46 = vpop.eup %1098 }
 0x1f6   :  { %v483_v47 = vmul.f32 %v1099_v46, %v481_v45 }
 0x1f8   :  { %v484_v48 = vmul.f32 %v1099_v46, %v483_v47 }
 0x1fa   :  { %v485_v49 = vmul.f32 0.5, %v484_v48 }
 0x1fc   :  { %v486_v50 = vsub.f32 1.5, %v485_v49 }
 0x1fe   :  { %v487_v51 = vmul.f32 %v1099_v46, %v486_v50 }
 0x200   :  { %v488_v52 = vmul.f32 %v487_v51, %v481_v45 }
 0x202   :  { %v490_v55 = vsel %vm489_vm1, %v481_v45, %v488_v52 }
 0x203   :  { %v493_v56 = vsel %vm491_vm2, %v492_v54, %v490_v55 }
 0x204   :  { %v494_v57 = vmul.f32 %v493_v56, %v480_v53 }
 0x206   :  { %v495_v58 = vadd.f32 %v494_v57, %v449_v22 }
 0x208   :  { %760 = vrot.lane.b32.xlu1 %v495_v58, %s1346_s19  ;;  %v496_v59 = vpack.c.bf16 %v495_v58, %v495_v58 }
 0x20a   :  { %573 = vmatmul.bf16.vlgmr.msrb.gmra.mxu0 %v496_v59 }
 0x244   :  { %v753_v32 = vpop.permute.xlu0 %752 }
 0x25f   :  { %v757_v36 = vpop.permute.xlu0 %756 }
 0x27a   :  { %v761_v38 = vpop.permute.xlu1 %760 }
 0x287   :  { %v574_v11 = vpop.f32.mrf.mxu0 }
 0x288   :  { %v575_v12 = vadd.f32 %v1091_v10, %v574_v11 }
 0x28a   :  { %v578_v13 = vmax.f32 %v575_v12, 0.0 }
 0x28c   :  { %v579_v14 = vpack.c.bf16 %v578_v13, %v578_v13 }
 0x28e   :  { %656 = vmatmul.bf16.vlgmr.msrb.gmra.mxu1 %v579_v14 }
 0x28f   :  { %v576_v15 = vpop.f32.mrf.mxu0 }
 0x30b   :  { %v657_v19 = vpop.f32.mrf.mxu1 }
 0x30c   :  { %v658_v20 = vadd.f32 %v1092_v18, %v657_v19 }
 0x30e   :  { %v661_v21 = vmax.f32 %v658_v20, 0.0 }
 0x310   :  { %v662_v22 = vpack.c.bf16 %v661_v21, %v661_v21 }
 0x312   :  { %739 = vmatmul.bf16.vlgmr.msrb.gmra.mxu2 %v662_v22 }
 0x313   :  { %v659_v23 = vpop.f32.mrf.mxu1 }
 0x395   :  { %v740_v25 = vpop.f32.mrf.mxu2 }
 0x396   :  { %v741_v26 = vadd.f32 %v1093_v24, %v740_v25 }
 0x398   :  { %v744_v27 = vsub.f32 0.0, %v741_v26 }
 0x39a   :  { %v745_v28 = vmul.f32 1.442695, %v744_v27 }
 0x39c   :  { %1100 = vpow2.f32 %v745_v28 }
 0x39d   :  { %v742_v29 = vpop.f32.mrf.mxu2 }
 0x3a2   :  { %v1101_v30 = vpop.eup %1100 }
 0x3a3   :  { %v747_v31 = vadd.f32 1.0, %v1101_v30 }
 0x3a5   :  { %1102 = vrcp.f32 %v747_v31 }
 0x3ab   :  { %v1103_v33 = vpop.eup %1102 }
 0x3ac   :  { %v749_v34 = vmax.f32 %v1103_v33, 0.0 }
 0x3ae   :  { %v750_v35 = vmin.f32 %v749_v34, 1.0 }
 0x3b0   :  { %v764_v37 = vsel %vm763_vm3, %v750_v35, %v753_v32 }
 0x3b1   :  { %v766_v39 = vsel %vm765_vm4, %v764_v37, %v757_v36 }
 0x3b2   :  { %v768_v40 = vsel %vm767_vm5, %v766_v39, %v761_v38 }
 0x3b3   :  { %v770_v41 = vsel %vm769_vm6, %v768_v40, 0.0 }
 0x3b4   :  { %771 = vst [vmem:[#allocation16] sm:$0xff] %v770_v41 }
 0x3b5   :  { %782 = dma.vmem_to_hbm [thread:$0]  %s778_s24, 128, %s780_s2, [#allocation4]  }
 0x3b6   :  { %1330 = dma.done.wait [#allocation4], 128  }
 0x3b7   :  { %1331 = vsyncadd [#allocation4], 4294967168 }
 0x3b8   :  { %787 = vsyncpa [#allocation3], 1 }
 0x3b9   :  { %788 = vsyncpa [#allocation6], 1 }
 0x3ba   :  { %789 = vsyncpa [#allocation9], 1 }
 0x3bb   :  { %790 = vsyncpa [#allocation12], 1 }
 0x3bc   :  { %791 = vsyncpa [#allocation15], 1 }
 0x3bd   :  { %792 = vsyncpa [#allocation4], 1 }

</bundles_post_ra>
